<compile_context>
chip_gen: v7x
topology: tpu7x:2x2x1
jax: 0.10.0
libtpu: 0.0.40
codegen_flags: <defaults>
</compile_context>

<pallas_src>
import math
from functools import partial

import jax
import jax.numpy as jnp
import numpy as np
from jax import lax
from jax.experimental import pallas as pl
from jax.experimental.pallas import tpu as pltpu


def _gelu_exact(x):
    # torch nn.GELU() default (approximate='none'): 0.5*x*(1+erf(x/sqrt(2))).
    # TODO(synk): tanh-approx GELU would ride the EUP slot instead of a VALU erf
    # polynomial, but torch's default is exact erf so fidelity is kept.
    return 0.5 * x * (1.0 + lax.erf(x * (1.0 / math.sqrt(2.0))))


def cross_block_kernel(x0_ref, x1_ref,
                       wqkv_ref, bqkv_ref, wout_ref, bout_ref,
                       w1_ref, b1_ref, lng_ref, lnb_ref, w2_ref, b2_ref,
                       o0_ref, o1_ref,
                       xb_sc, qk_sc, v_sc, msg_sc, slab_sc,
                       m_stat, l_stat, acc_stat,
                       *, heads, dim_head, embed_dim, n_tokens, kv_tile):
    E = embed_dim
    N = n_tokens
    D = dim_head
    tk = kv_tile
    num_kv = N // tk

    # ---- stack x0|x1 into one (2N, E) bf16 slab: every projection / FFN matmul
    #      then runs once with M = 2N (fewer MXU weight pushes).
    xb_sc[pl.ds(0, N), :] = x0_ref[0].astype(jnp.bfloat16)
    xb_sc[pl.ds(N, N), :] = x1_ref[0].astype(jnp.bfloat16)
    xb = xb_sc[...]                                                   # (2N, E) bf16

    # ---- merged QK|V projection (scale pre-folded into the qk half).
    qkv = jnp.dot(xb, wqkv_ref[...],
                  preferred_element_type=jnp.float32) + bqkv_ref[...]  # (2N, 2E) f32

    # ---- split heads once into head-major bf16 scratch (static lane slices here;
    #      only leading-axis dynamic indexing inside the head loop).
    for h in range(heads):
        qk_sc[h] = qkv[:, h * D:(h + 1) * D].astype(jnp.bfloat16)
        v_sc[h] = qkv[:, E + h * D:E + (h + 1) * D].astype(jnp.bfloat16)

    # ---- bidirectional cross attention, one head at a time, kv-tiled.
    @pl.loop(0, heads)
    def _head(h):
        q0 = qk_sc[h, pl.ds(0, N), :]        # (N, D): queries (fwd) / keys (rev)
        v0 = v_sc[h, pl.ds(0, N), :]         # (N, D): values for the reverse dir

        m_stat[...] = jnp.full_like(m_stat, -1e30)
        l_stat[...] = jnp.zeros_like(l_stat)
        acc_stat[...] = jnp.zeros_like(acc_stat)

        @pl.loop(0, num_kv)
        def _kv(t):
            r0 = pl.multiple_of(N + t * tk, tk)     # x1 rows of this kv tile
            q1t = qk_sc[h, pl.ds(r0, tk), :]        # (tk, D) bf16
            v1t = v_sc[h, pl.ds(r0, tk), :]         # (tk, D) bf16

            # q0 @ q1t^T: rhs-transposed contraction, MXU-native (no transpose).
            sim = lax.dot_general(q0, q1t, (((1,), (1,)), ((), ())),
                                  preferred_element_type=jnp.float32)  # (N, tk)

            # --- forward (messages to x0): online softmax over kv tiles.
            m_prev = m_stat[...]
            m_new = jnp.maximum(m_prev, jnp.max(sim, axis=-1, keepdims=True))
            alpha = jnp.exp(m_prev - m_new)
            p = jnp.exp(sim - m_new)                 # the ONE full exp per tile
            l_stat[...] = alpha * l_stat[...] + jnp.sum(p, axis=-1, keepdims=True)
            acc_stat[...] = alpha * acc_stat[...] + jnp.dot(
                p.astype(jnp.bfloat16), v1t, preferred_element_type=jnp.float32)
            m_stat[...] = m_new

            # --- reverse (messages to x1): exact column softmax over all N x0
            #     rows, derived from the same exp via row weights exp(m_new - K)
            #     => pw == exp(sim - K) (shift-invariant).  Guard only triggers if
            #     a whole column underflows; message then degrades to zero.
            K = jnp.max(m_new, axis=0, keepdims=True)            # (1, 1)
            pw = p * jnp.exp(m_new - K)                          # (N, tk)
            denom = jnp.maximum(jnp.sum(pw, axis=0, keepdims=True), 1e-30)
            a10 = pw * pl.reciprocal(denom, approx=True)
            # Contraction over the x0 axis; bounded to an (N, tk) tile either way.
            # TODO(synk): confirm via bundle dump that no explicit XLU transpose
            # of a10 is materialized.
            m1_t = lax.dot_general(a10.astype(jnp.bfloat16), v0,
                                   (((0,), (0,)), ((), ())),
                                   preferred_element_type=jnp.float32)  # (tk, D)
            msg_sc[h, pl.ds(r0, tk), :] = m1_t.astype(jnp.bfloat16)

        # finalize forward messages for this head (bf16: next use is bf16 anyway).
        m0h = acc_stat[...] * pl.reciprocal(l_stat[...], approx=True)
        msg_sc[h, pl.ds(0, N), :] = m0h.astype(jnp.bfloat16)

    # ---- re-layout head-major messages into a lane-dense (2N, E) bf16 slab so
    #      the output projection is a single full-K dot.
    for h in range(heads):
        slab_sc[:, h * D:(h + 1) * D] = msg_sc[h]

    m_all = jnp.dot(slab_sc[...], wout_ref[...],
                    preferred_element_type=jnp.float32) + bout_ref[...]  # (2N, E)

    # ---- FFN: Linear(2E,2E) -> LayerNorm(2E) -> GELU -> Linear(2E,E), with the
    #      concat([x, m], -1) realised as a split matmul and one-pass LN stats.
    h1 = (jnp.dot(xb, w1_ref[0:E, :], preferred_element_type=jnp.float32)
          + jnp.dot(m_all.astype(jnp.bfloat16), w1_ref[E:2 * E, :],
                    preferred_element_type=jnp.float32)
          + b1_ref[...])                                                 # (2N, 2E)
    inv_n = 1.0 / (2 * E)
    mu = jnp.sum(h1, axis=-1, keepdims=True) * inv_n
    ms = jnp.sum(h1 * h1, axis=-1, keepdims=True) * inv_n
    var = jnp.maximum(ms - mu * mu, 0.0)                # biased var, like torch LN
    hn = (h1 - mu) * lax.rsqrt(var + 1e-5)
    hn = hn * lng_ref[...] + lnb_ref[...]
    act = _gelu_exact(hn)
    y = jnp.dot(act.astype(jnp.bfloat16), w2_ref[...],
                preferred_element_type=jnp.float32) + b2_ref[...]        # (2N, E)

    o0_ref[0] = (x0_ref[0] + y[0:N, :]).astype(o0_ref.dtype)
    o1_ref[0] = (x1_ref[0] + y[N:2 * N, :]).astype(o1_ref.dtype)


def _vmem_limit_bytes():
    # Generation-aware scoped-VMEM budget: ~32 MiB on v7x-class parts (64 MiB/TC),
    # 48 MiB on v5e/v6e-class parts (128 MiB).
    try:
        cap = int(pltpu.get_tpu_info().vmem_capacity_bytes)
    except Exception:
        cap = 64 * 1024 * 1024
    return 48 * 1024 * 1024 if cap >= 100 * 1024 * 1024 else 32 * 1024 * 1024


def _pick_kv_tile(n):
    if n <= 512:
        return n
    for t in (512, 256, 128):
        if n % t == 0:
            return t
    return n


def cross_block(x0, x1, params, *, heads):
    B, N, E = x0.shape
    assert x1.shape == (B, N, E)
    assert E % heads == 0 and N % 8 == 0
    dim_head = E // heads
    tk = _pick_kv_tile(N)
    assert N % tk == 0 and tk % 8 == 0

    wqk, bqk, wv, bv, wout, bout, w1, b1, lng, lnb, w2, b2 = params

    # One-time parameter prep: fold dim_head**-0.25 into the shared qk projection
    # (applies to both q and k), merge qk|v weights, cast weights to bf16 (biases
    # and LN params stay f32: they apply after f32 accumulation).
    s = float(dim_head) ** (-0.25)
    wqkv = jnp.concatenate([wqk * s, wv], axis=1).astype(jnp.bfloat16)       # (E, 2E)
    bqkv = jnp.concatenate([bqk * s, bv], axis=0).reshape(1, 2 * E)          # (1, 2E)

    flat = [wqkv, bqkv,
            wout.astype(jnp.bfloat16), bout.reshape(1, E),
            w1.astype(jnp.bfloat16), b1.reshape(1, 2 * E),
            lng.reshape(1, 2 * E), lnb.reshape(1, 2 * E),
            w2.astype(jnp.bfloat16), b2.reshape(1, E)]

    param_specs = [pl.BlockSpec(p.shape, lambda b: (0, 0)) for p in flat]
    seq_spec = pl.BlockSpec((1, N, E), lambda b: (b, 0, 0))

    out_shape = (jax.ShapeDtypeStruct((B, N, E), x0.dtype),
                 jax.ShapeDtypeStruct((B, N, E), x1.dtype))

    scratch = [
        pltpu.VMEM((2 * N, E), jnp.bfloat16),                 # xb_sc
        pltpu.VMEM((heads, 2 * N, dim_head), jnp.bfloat16),   # qk_sc (head-major)
        pltpu.VMEM((heads, 2 * N, dim_head), jnp.bfloat16),   # v_sc
        pltpu.VMEM((heads, 2 * N, dim_head), jnp.bfloat16),   # msg_sc (bf16 msgs)
        pltpu.VMEM((2 * N, E), jnp.bfloat16),                 # slab_sc
        pltpu.VMEM((N, 1), jnp.float32),                      # m_stat (running max)
        pltpu.VMEM((N, 1), jnp.float32),                      # l_stat (running sum)
        pltpu.VMEM((N, dim_head), jnp.float32),               # acc_stat
    ]

    fn = pl.pallas_call(
        partial(cross_block_kernel, heads=heads, dim_head=dim_head,
                embed_dim=E, n_tokens=N, kv_tile=tk),
        out_shape=out_shape,
        grid=(B,),
        in_specs=[seq_spec, seq_spec] + param_specs,
        out_specs=(seq_spec, seq_spec),
        scratch_shapes=scratch,
        compiler_params=pltpu.CompilerParams(
            dimension_semantics=("parallel",),
            vmem_limit_bytes=_vmem_limit_bytes()),
    )
    return fn(x0, x1, *flat)


# ----------------------- pure-JAX reference (for checking) -----------------------
def cross_block_ref(x0, x1, params, *, heads):
    wqk, bqk, wv, bv, wout, bout, w1, b1, lng, lnb, w2, b2 = params
    B, N, E = x0.shape
    D = E // heads

    def proj(x, W, b):
        return x @ W + b

    qk0, qk1 = proj(x0, wqk, bqk), proj(x1, wqk, bqk)
    v0, v1 = proj(x0, wv, bv), proj(x1, wv, bv)

    def split(t):
        return t.reshape(B, N, heads, D).transpose(0, 2, 1, 3)

    qk0, qk1, v0, v1 = map(split, (qk0, qk1, v0, v1))
    s = float(D) ** (-0.25)
    sim = jnp.einsum('bhid,bhjd->bhij', qk0 * s, qk1 * s)
    a01 = jax.nn.softmax(sim, axis=-1)
    a10 = jax.nn.softmax(jnp.swapaxes(sim, -1, -2), axis=-1)
    m0 = jnp.einsum('bhij,bhjd->bhid', a01, v1)
    m1 = jnp.einsum('bhij,bhjd->bhid', a10, v0)

    def merge(t):
        return t.transpose(0, 2, 1, 3).reshape(B, N, E)

    m0 = proj(merge(m0), wout, bout)
    m1 = proj(merge(m1), wout, bout)

    def ffn(x, m):
        h = jnp.concatenate([x, m], axis=-1) @ w1 + b1
        mu = h.mean(-1, keepdims=True)
        var = ((h - mu) ** 2).mean(-1, keepdims=True)
        hn = (h - mu) / jnp.sqrt(var + 1e-5) * lng + lnb
        act = 0.5 * hn * (1.0 + jax.scipy.special.erf(hn / math.sqrt(2.0)))
        return act @ w2 + b2

    return x0 + ffn(x0, m0), x1 + ffn(x1, m1)


def make_params(key, embed_dim):
    E = embed_dim

    def linear(kw, kb, fan_in, fan_out):
        bound = 1.0 / math.sqrt(fan_in)
        W = jax.random.uniform(kw, (fan_in, fan_out), jnp.float32, -bound, bound)
        b = jax.random.uniform(kb, (fan_out,), jnp.float32, -bound, bound)
        return W, b

    ks = jax.random.split(key, 10)
    wqk, bqk = linear(ks[0], ks[1], E, E)
    wv, bv = linear(ks[2], ks[3], E, E)
    wout, bout = linear(ks[4], ks[5], E, E)
    w1, b1 = linear(ks[6], ks[7], 2 * E, 2 * E)
    lng = jnp.ones((2 * E,), jnp.float32)    # torch LayerNorm init
    lnb = jnp.zeros((2 * E,), jnp.float32)
    w2, b2 = linear(ks[8], ks[9], 2 * E, E)
    return (wqk, bqk, wv, bv, wout, bout, w1, b1, lng, lnb, w2, b2)


if __name__ == "__main__":
    # batch, tokens, embed_dim, heads (dim_head = 32); E=128 keeps tiles lane-dense.
    B, N, E, H = 2, 16, 128, 4

    key = jax.random.PRNGKey(0)
    kx0, kx1, kp = jax.random.split(key, 3)
    x0 = jax.random.normal(kx0, (B, N, E), jnp.float32)
    x1 = jax.random.normal(kx1, (B, N, E), jnp.float32)
    params = make_params(kp, E)

    y0, y1 = cross_block(x0, x1, params, heads=H)
    jax.block_until_ready((y0, y1))

    r0, r1 = cross_block_ref(x0, x1, params, heads=H)
    # bf16 MXU operands vs f32 reference -> relaxed tolerance.
    np.testing.assert_allclose(np.asarray(y0), np.asarray(r0), rtol=3e-2, atol=3e-2)
    np.testing.assert_allclose(np.asarray(y1), np.asarray(r1), rtol=3e-2, atol=3e-2)

    print("KERNEL_OK")
</pallas_src>

<mosaic_0001>
module attributes {stable_mosaic.version = 11 : i64} {
  func.func @cross_block_kernel(%arg0: i32, %arg1: memref<1x16x128xf32, #tpu.memory_space<vmem>>, %arg2: memref<1x16x128xf32, #tpu.memory_space<vmem>>, %arg3: memref<128x256xbf16, #tpu.memory_space<vmem>>, %arg4: memref<1x256xf32, #tpu.memory_space<vmem>>, %arg5: memref<128x128xbf16, #tpu.memory_space<vmem>>, %arg6: memref<1x128xf32, #tpu.memory_space<vmem>>, %arg7: memref<256x256xbf16, #tpu.memory_space<vmem>>, %arg8: memref<1x256xf32, #tpu.memory_space<vmem>>, %arg9: memref<1x256xf32, #tpu.memory_space<vmem>>, %arg10: memref<1x256xf32, #tpu.memory_space<vmem>>, %arg11: memref<256x128xbf16, #tpu.memory_space<vmem>>, %arg12: memref<1x128xf32, #tpu.memory_space<vmem>>, %arg13: memref<1x16x128xf32, #tpu.memory_space<vmem>>, %arg14: memref<1x16x128xf32, #tpu.memory_space<vmem>>, %arg15: memref<32x128xbf16, #tpu.memory_space<vmem>>, %arg16: memref<4x32x32xbf16, #tpu.memory_space<vmem>>, %arg17: memref<4x32x32xbf16, #tpu.memory_space<vmem>>, %arg18: memref<4x32x32xbf16, #tpu.memory_space<vmem>>, %arg19: memref<32x128xbf16, #tpu.memory_space<vmem>>, %arg20: memref<16x1xf32, #tpu.memory_space<vmem>>, %arg21: memref<16x1xf32, #tpu.memory_space<vmem>>, %arg22: memref<16x32xf32, #tpu.memory_space<vmem>>) attributes {dimension_semantics = [#tpu.dimension_semantics<parallel>], iteration_bounds = array<i64: 2>, scalar_prefetch = 0 : i64, scratch_operands = 8 : i64, tpu.core_type = #tpu.core_type<tc>, window_params = [{transform_indices = @transform_0, window_bounds = array<i64: 1, 16, 128>}, {transform_indices = @transform_1, window_bounds = array<i64: 1, 16, 128>}, {pipeline_mode = #tpu.pipeline_mode<synchronous>, transform_indices = @transform_2, window_bounds = array<i64: 128, 256>}, {pipeline_mode = #tpu.pipeline_mode<synchronous>, transform_indices = @transform_3, window_bounds = array<i64: 1, 256>}, {pipeline_mode = #tpu.pipeline_mode<synchronous>, transform_indices = @transform_4, window_bounds = array<i64: 128, 128>}, {pipeline_mode = #tpu.pipeline_mode<synchronous>, transform_indices = @transform_5, window_bounds = array<i64: 1, 128>}, {pipeline_mode = #tpu.pipeline_mode<synchronous>, transform_indices = @transform_6, window_bounds = array<i64: 256, 256>}, {pipeline_mode = #tpu.pipeline_mode<synchronous>, transform_indices = @transform_7, window_bounds = array<i64: 1, 256>}, {pipeline_mode = #tpu.pipeline_mode<synchronous>, transform_indices = @transform_8, window_bounds = array<i64: 1, 256>}, {pipeline_mode = #tpu.pipeline_mode<synchronous>, transform_indices = @transform_9, window_bounds = array<i64: 1, 256>}, {pipeline_mode = #tpu.pipeline_mode<synchronous>, transform_indices = @transform_10, window_bounds = array<i64: 256, 128>}, {pipeline_mode = #tpu.pipeline_mode<synchronous>, transform_indices = @transform_11, window_bounds = array<i64: 1, 128>}, {transform_indices = @transform_12, window_bounds = array<i64: 1, 16, 128>}, {transform_indices = @transform_13, window_bounds = array<i64: 1, 16, 128>}]} {
    %c0 = arith.constant 0 : index
    %c0_0 = arith.constant 0 : index
    %c0_1 = arith.constant 0 : index
    %0 = vector.load %arg1[%c0, %c0_0, %c0_1] : memref<1x16x128xf32, #tpu.memory_space<vmem>>, vector<1x16x128xf32>
    %1 = vector.shape_cast %0 : vector<1x16x128xf32> to vector<16x128xf32>
    %2 = arith.truncf %1 : vector<16x128xf32> to vector<16x128xbf16>
    %c0_2 = arith.constant 0 : index
    %c0_3 = arith.constant 0 : index
    %3 = vector.load %arg15[%c0_2, %c0_3] : memref<32x128xbf16, #tpu.memory_space<vmem>>, vector<16x128xbf16>
    tpu.vector_store %arg15[%c0_2, %c0_3], %2 {strides = array<i32>} : memref<32x128xbf16, #tpu.memory_space<vmem>>, vector<16x128xbf16>,
    %c0_4 = arith.constant 0 : index
    %c0_5 = arith.constant 0 : index
    %c0_6 = arith.constant 0 : index
    %4 = vector.load %arg2[%c0_4, %c0_5, %c0_6] : memref<1x16x128xf32, #tpu.memory_space<vmem>>, vector<1x16x128xf32>
    %5 = vector.shape_cast %4 : vector<1x16x128xf32> to vector<16x128xf32>
    %6 = arith.truncf %5 : vector<16x128xf32> to vector<16x128xbf16>
    %c16 = arith.constant 16 : index
    %c0_7 = arith.constant 0 : index
    %7 = vector.load %arg15[%c16, %c0_7] : memref<32x128xbf16, #tpu.memory_space<vmem>>, vector<16x128xbf16>
    tpu.vector_store %arg15[%c16, %c0_7], %6 {strides = array<i32>} : memref<32x128xbf16, #tpu.memory_space<vmem>>, vector<16x128xbf16>,
    %c0_8 = arith.constant 0 : index
    %c0_9 = arith.constant 0 : index
    %8 = vector.load %arg15[%c0_8, %c0_9] : memref<32x128xbf16, #tpu.memory_space<vmem>>, vector<32x128xbf16>
    %c0_10 = arith.constant 0 : index
    %c0_11 = arith.constant 0 : index
    %9 = vector.load %arg3[%c0_10, %c0_11] : memref<128x256xbf16, #tpu.memory_space<vmem>>, vector<128x256xbf16>
    %cst = arith.constant dense<0.000000e+00> : vector<32x256xf32>
    %10 = tpu.matmul %8, %9, %cst {dimension_numbers = #tpu.dot_dimension_numbers<[1], [0], [0], [1], [0, 0, 1, 1], [], []>} : vector<32x128xbf16>, vector<128x256xbf16>, vector<32x256xf32> -> vector<32x256xf32>
    %c0_12 = arith.constant 0 : index
    %c0_13 = arith.constant 0 : index
    %11 = vector.load %arg4[%c0_12, %c0_13] : memref<1x256xf32, #tpu.memory_space<vmem>>, vector<1x256xf32>
    %12 = vector.broadcast %11 : vector<1x256xf32> to vector<32x256xf32>
    %13 = arith.addf %10, %12 : vector<32x256xf32>
    %14 = vector.extract_strided_slice %13 {offsets = [0, 0], sizes = [32, 32], strides = [1, 1]} : vector<32x256xf32> to vector<32x32xf32>
    %15 = arith.truncf %14 : vector<32x32xf32> to vector<32x32xbf16>
    %c0_14 = arith.constant 0 : index
    %c0_15 = arith.constant 0 : index
    %c0_16 = arith.constant 0 : index
    %16 = vector.load %arg16[%c0_14, %c0_15, %c0_16] : memref<4x32x32xbf16, #tpu.memory_space<vmem>>, vector<1x32x32xbf16>
    %17 = vector.shape_cast %16 : vector<1x32x32xbf16> to vector<32x32xbf16>
    %18 = vector.shape_cast %15 : vector<32x32xbf16> to vector<1x32x32xbf16>
    tpu.vector_store %arg16[%c0_14, %c0_15, %c0_16], %18 {strides = array<i32>} : memref<4x32x32xbf16, #tpu.memory_space<vmem>>, vector<1x32x32xbf16>,
    %19 = vector.extract_strided_slice %13 {offsets = [0, 128], sizes = [32, 32], strides = [1, 1]} : vector<32x256xf32> to vector<32x32xf32>
    %20 = arith.truncf %19 : vector<32x32xf32> to vector<32x32xbf16>
    %c0_17 = arith.constant 0 : index
    %c0_18 = arith.constant 0 : index
    %c0_19 = arith.constant 0 : index
    %21 = vector.load %arg17[%c0_17, %c0_18, %c0_19] : memref<4x32x32xbf16, #tpu.memory_space<vmem>>, vector<1x32x32xbf16>
    %22 = vector.shape_cast %21 : vector<1x32x32xbf16> to vector<32x32xbf16>
    %23 = vector.shape_cast %20 : vector<32x32xbf16> to vector<1x32x32xbf16>
    tpu.vector_store %arg17[%c0_17, %c0_18, %c0_19], %23 {strides = array<i32>} : memref<4x32x32xbf16, #tpu.memory_space<vmem>>, vector<1x32x32xbf16>,
    %24 = vector.extract_strided_slice %13 {offsets = [0, 32], sizes = [32, 32], strides = [1, 1]} : vector<32x256xf32> to vector<32x32xf32>
    %25 = arith.truncf %24 : vector<32x32xf32> to vector<32x32xbf16>
    %c1 = arith.constant 1 : index
    %c0_20 = arith.constant 0 : index
    %c0_21 = arith.constant 0 : index
    %26 = vector.load %arg16[%c1, %c0_20, %c0_21] : memref<4x32x32xbf16, #tpu.memory_space<vmem>>, vector<1x32x32xbf16>
    %27 = vector.shape_cast %26 : vector<1x32x32xbf16> to vector<32x32xbf16>
    %28 = vector.shape_cast %25 : vector<32x32xbf16> to vector<1x32x32xbf16>
    tpu.vector_store %arg16[%c1, %c0_20, %c0_21], %28 {strides = array<i32>} : memref<4x32x32xbf16, #tpu.memory_space<vmem>>, vector<1x32x32xbf16>,
    %29 = vector.extract_strided_slice %13 {offsets = [0, 160], sizes = [32, 32], strides = [1, 1]} : vector<32x256xf32> to vector<32x32xf32>
    %30 = arith.truncf %29 : vector<32x32xf32> to vector<32x32xbf16>
    %c1_22 = arith.constant 1 : index
    %c0_23 = arith.constant 0 : index
    %c0_24 = arith.constant 0 : index
    %31 = vector.load %arg17[%c1_22, %c0_23, %c0_24] : memref<4x32x32xbf16, #tpu.memory_space<vmem>>, vector<1x32x32xbf16>
    %32 = vector.shape_cast %31 : vector<1x32x32xbf16> to vector<32x32xbf16>
    %33 = vector.shape_cast %30 : vector<32x32xbf16> to vector<1x32x32xbf16>
    tpu.vector_store %arg17[%c1_22, %c0_23, %c0_24], %33 {strides = array<i32>} : memref<4x32x32xbf16, #tpu.memory_space<vmem>>, vector<1x32x32xbf16>,
    %34 = vector.extract_strided_slice %13 {offsets = [0, 64], sizes = [32, 32], strides = [1, 1]} : vector<32x256xf32> to vector<32x32xf32>
    %35 = arith.truncf %34 : vector<32x32xf32> to vector<32x32xbf16>
    %c2 = arith.constant 2 : index
    %c0_25 = arith.constant 0 : index
    %c0_26 = arith.constant 0 : index
    %36 = vector.load %arg16[%c2, %c0_25, %c0_26] : memref<4x32x32xbf16, #tpu.memory_space<vmem>>, vector<1x32x32xbf16>
    %37 = vector.shape_cast %36 : vector<1x32x32xbf16> to vector<32x32xbf16>
    %38 = vector.shape_cast %35 : vector<32x32xbf16> to vector<1x32x32xbf16>
    tpu.vector_store %arg16[%c2, %c0_25, %c0_26], %38 {strides = array<i32>} : memref<4x32x32xbf16, #tpu.memory_space<vmem>>, vector<1x32x32xbf16>,
    %39 = vector.extract_strided_slice %13 {offsets = [0, 192], sizes = [32, 32], strides = [1, 1]} : vector<32x256xf32> to vector<32x32xf32>
    %40 = arith.truncf %39 : vector<32x32xf32> to vector<32x32xbf16>
    %c2_27 = arith.constant 2 : index
    %c0_28 = arith.constant 0 : index
    %c0_29 = arith.constant 0 : index
    %41 = vector.load %arg17[%c2_27, %c0_28, %c0_29] : memref<4x32x32xbf16, #tpu.memory_space<vmem>>, vector<1x32x32xbf16>
    %42 = vector.shape_cast %41 : vector<1x32x32xbf16> to vector<32x32xbf16>
    %43 = vector.shape_cast %40 : vector<32x32xbf16> to vector<1x32x32xbf16>
    tpu.vector_store %arg17[%c2_27, %c0_28, %c0_29], %43 {strides = array<i32>} : memref<4x32x32xbf16, #tpu.memory_space<vmem>>, vector<1x32x32xbf16>,
    %44 = vector.extract_strided_slice %13 {offsets = [0, 96], sizes = [32, 32], strides = [1, 1]} : vector<32x256xf32> to vector<32x32xf32>
    %45 = arith.truncf %44 : vector<32x32xf32> to vector<32x32xbf16>
    %c3 = arith.constant 3 : index
    %c0_30 = arith.constant 0 : index
    %c0_31 = arith.constant 0 : index
    %46 = vector.load %arg16[%c3, %c0_30, %c0_31] : memref<4x32x32xbf16, #tpu.memory_space<vmem>>, vector<1x32x32xbf16>
    %47 = vector.shape_cast %46 : vector<1x32x32xbf16> to vector<32x32xbf16>
    %48 = vector.shape_cast %45 : vector<32x32xbf16> to vector<1x32x32xbf16>
    tpu.vector_store %arg16[%c3, %c0_30, %c0_31], %48 {strides = array<i32>} : memref<4x32x32xbf16, #tpu.memory_space<vmem>>, vector<1x32x32xbf16>,
    %49 = vector.extract_strided_slice %13 {offsets = [0, 224], sizes = [32, 32], strides = [1, 1]} : vector<32x256xf32> to vector<32x32xf32>
    %50 = arith.truncf %49 : vector<32x32xf32> to vector<32x32xbf16>
    %c3_32 = arith.constant 3 : index
    %c0_33 = arith.constant 0 : index
    %c0_34 = arith.constant 0 : index
    %51 = vector.load %arg17[%c3_32, %c0_33, %c0_34] : memref<4x32x32xbf16, #tpu.memory_space<vmem>>, vector<1x32x32xbf16>
    %52 = vector.shape_cast %51 : vector<1x32x32xbf16> to vector<32x32xbf16>
    %53 = vector.shape_cast %50 : vector<32x32xbf16> to vector<1x32x32xbf16>
    tpu.vector_store %arg17[%c3_32, %c0_33, %c0_34], %53 {strides = array<i32>} : memref<4x32x32xbf16, #tpu.memory_space<vmem>>, vector<1x32x32xbf16>,
    %c0_i32 = arith.constant 0 : i32
    %c4_i32 = arith.constant 4 : i32
    %54 = arith.addi %c0_i32, %c4_i32 : i32
    %c1_i32 = arith.constant 1 : i32
    scf.for %arg23 = %c0_i32 to %54 step %c1_i32  : i32 {
      %c1_i32_97 = arith.constant 1 : i32
      %136 = arith.muli %arg23, %c1_i32_97 : i32
      %c0_i32_98 = arith.constant 0 : i32
      %137 = arith.addi %c0_i32_98, %136 : i32
      %138 = arith.index_cast %137 : i32 to index
      %c0_99 = arith.constant 0 : index
      %c0_100 = arith.constant 0 : index
      %139 = vector.load %arg16[%138, %c0_99, %c0_100] : memref<4x32x32xbf16, #tpu.memory_space<vmem>>, vector<1x16x32xbf16>
      %140 = vector.shape_cast %139 : vector<1x16x32xbf16> to vector<16x32xbf16>
      %141 = arith.index_cast %137 : i32 to index
      %c0_101 = arith.constant 0 : index
      %c0_102 = arith.constant 0 : index
      %142 = vector.load %arg17[%141, %c0_101, %c0_102] : memref<4x32x32xbf16, #tpu.memory_space<vmem>>, vector<1x16x32xbf16>
      %143 = vector.shape_cast %142 : vector<1x16x32xbf16> to vector<16x32xbf16>
      %cst_103 = arith.constant -1.000000e+30 : f32
      %144 = vector.broadcast %cst_103 : f32 to vector<16x1xf32>
      %c0_104 = arith.constant 0 : index
      %c0_105 = arith.constant 0 : index
      %145 = vector.load %arg20[%c0_104, %c0_105] : memref<16x1xf32, #tpu.memory_space<vmem>>, vector<16x1xf32>
      tpu.vector_store %arg20[%c0_104, %c0_105], %144 {strides = array<i32>} : memref<16x1xf32, #tpu.memory_space<vmem>>, vector<16x1xf32>,
      %cst_106 = arith.constant 0.000000e+00 : f32
      %146 = vector.broadcast %cst_106 : f32 to vector<16x1xf32>
      %c0_107 = arith.constant 0 : index
      %c0_108 = arith.constant 0 : index
      %147 = vector.load %arg21[%c0_107, %c0_108] : memref<16x1xf32, #tpu.memory_space<vmem>>, vector<16x1xf32>
      tpu.vector_store %arg21[%c0_107, %c0_108], %146 {strides = array<i32>} : memref<16x1xf32, #tpu.memory_space<vmem>>, vector<16x1xf32>,
      %cst_109 = arith.constant 0.000000e+00 : f32
      %148 = vector.broadcast %cst_109 : f32 to vector<16x32xf32>
      %c0_110 = arith.constant 0 : index
      %c0_111 = arith.constant 0 : index
      %149 = vector.load %arg22[%c0_110, %c0_111] : memref<16x32xf32, #tpu.memory_space<vmem>>, vector<16x32xf32>
      tpu.vector_store %arg22[%c0_110, %c0_111], %148 {strides = array<i32>} : memref<16x32xf32, #tpu.memory_space<vmem>>, vector<16x32xf32>,
      %c0_i32_112 = arith.constant 0 : i32
      %c1_i32_113 = arith.constant 1 : i32
      %150 = arith.muli %c0_i32_112, %c1_i32_113 : i32
      %c0_i32_114 = arith.constant 0 : i32
      %151 = arith.addi %c0_i32_114, %150 : i32
      %c16_i32 = arith.constant 16 : i32
      %152 = arith.muli %151, %c16_i32 : i32
      %c16_i32_115 = arith.constant 16 : i32
      %153 = arith.addi %c16_i32_115, %152 : i32
      %154 = tpu.assume_multiple %153, 16 : i32
      %155 = arith.index_cast %137 : i32 to index
      %156 = arith.index_cast %154 : i32 to index
      %c0_116 = arith.constant 0 : index
      %157 = vector.load %arg16[%155, %156, %c0_116] : memref<4x32x32xbf16, #tpu.memory_space<vmem>>, vector<1x16x32xbf16>
      %158 = vector.shape_cast %157 : vector<1x16x32xbf16> to vector<16x32xbf16>
      %159 = arith.index_cast %137 : i32 to index
      %160 = arith.index_cast %154 : i32 to index
      %c0_117 = arith.constant 0 : index
      %161 = vector.load %arg17[%159, %160, %c0_117] : memref<4x32x32xbf16, #tpu.memory_space<vmem>>, vector<1x16x32xbf16>
      %162 = vector.shape_cast %161 : vector<1x16x32xbf16> to vector<16x32xbf16>
      %cst_118 = arith.constant dense<0.000000e+00> : vector<16x16xf32>
      %163 = tpu.matmul %140, %158, %cst_118 {dimension_numbers = #tpu.dot_dimension_numbers<[1], [1], [0], [0], [0, 0, 1, 0], [], []>} : vector<16x32xbf16>, vector<16x32xbf16>, vector<16x16xf32> -> vector<16x16xf32>
      %c0_119 = arith.constant 0 : index
      %c0_120 = arith.constant 0 : index
      %164 = vector.load %arg20[%c0_119, %c0_120] : memref<16x1xf32, #tpu.memory_space<vmem>>, vector<16x1xf32>
      %cst_121 = arith.constant dense<0xFF800000> : vector<16xf32>
      %165 = vector.multi_reduction <maximumf>, %163, %cst_121 [1] : vector<16x16xf32> to vector<16xf32>
      %166 = vector.shape_cast %165 : vector<16xf32> to vector<16x1xf32>
      %167 = arith.maximumf %164, %166 : vector<16x1xf32>
      %168 = arith.subf %164, %167 : vector<16x1xf32>
      %169 = math.exp %168 : vector<16x1xf32>
      %170 = vector.broadcast %167 : vector<16x1xf32> to vector<16x16xf32>
      %171 = arith.subf %163, %170 : vector<16x16xf32>
      %172 = math.exp %171 : vector<16x16xf32>
      %c0_122 = arith.constant 0 : index
      %c0_123 = arith.constant 0 : index
      %173 = vector.load %arg21[%c0_122, %c0_123] : memref<16x1xf32, #tpu.memory_space<vmem>>, vector<16x1xf32>
      %174 = arith.mulf %169, %173 : vector<16x1xf32>
      %cst_124 = arith.constant dense<0.000000e+00> : vector<16xf32>
      %175 = vector.multi_reduction <add>, %172, %cst_124 [1] : vector<16x16xf32> to vector<16xf32>
      %176 = vector.shape_cast %175 : vector<16xf32> to vector<16x1xf32>
      %177 = arith.addf %174, %176 : vector<16x1xf32>
      %c0_125 = arith.constant 0 : index
      %c0_126 = arith.constant 0 : index
      %178 = vector.load %arg21[%c0_125, %c0_126] : memref<16x1xf32, #tpu.memory_space<vmem>>, vector<16x1xf32>
      tpu.vector_store %arg21[%c0_125, %c0_126], %177 {strides = array<i32>} : memref<16x1xf32, #tpu.memory_space<vmem>>, vector<16x1xf32>,
      %c0_127 = arith.constant 0 : index
      %c0_128 = arith.constant 0 : index
      %179 = vector.load %arg22[%c0_127, %c0_128] : memref<16x32xf32, #tpu.memory_space<vmem>>, vector<16x32xf32>
      %180 = vector.broadcast %169 : vector<16x1xf32> to vector<16x32xf32>
      %181 = arith.mulf %180, %179 : vector<16x32xf32>
      %182 = arith.truncf %172 : vector<16x16xf32> to vector<16x16xbf16>
      %cst_129 = arith.constant dense<0.000000e+00> : vector<16x32xf32>
      %183 = tpu.matmul %182, %162, %cst_129 {dimension_numbers = #tpu.dot_dimension_numbers<[1], [0], [0], [1], [0, 0, 1, 1], [], []>} : vector<16x16xbf16>, vector<16x32xbf16>, vector<16x32xf32> -> vector<16x32xf32>
      %184 = arith.addf %181, %183 : vector<16x32xf32>
      %c0_130 = arith.constant 0 : index
      %c0_131 = arith.constant 0 : index
      %185 = vector.load %arg22[%c0_130, %c0_131] : memref<16x32xf32, #tpu.memory_space<vmem>>, vector<16x32xf32>
      tpu.vector_store %arg22[%c0_130, %c0_131], %184 {strides = array<i32>} : memref<16x32xf32, #tpu.memory_space<vmem>>, vector<16x32xf32>,
      %c0_132 = arith.constant 0 : index
      %c0_133 = arith.constant 0 : index
      %186 = vector.load %arg20[%c0_132, %c0_133] : memref<16x1xf32, #tpu.memory_space<vmem>>, vector<16x1xf32>
      tpu.vector_store %arg20[%c0_132, %c0_133], %167 {strides = array<i32>} : memref<16x1xf32, #tpu.memory_space<vmem>>, vector<16x1xf32>,
      %cst_134 = arith.constant dense<0xFF800000> : vector<1xf32>
      %187 = vector.multi_reduction <maximumf>, %167, %cst_134 [0] : vector<16x1xf32> to vector<1xf32>
      %188 = vector.shape_cast %187 : vector<1xf32> to vector<1x1xf32>
      %189 = vector.broadcast %188 : vector<1x1xf32> to vector<16x1xf32>
      %190 = arith.subf %167, %189 : vector<16x1xf32>
      %191 = math.exp %190 : vector<16x1xf32>
      %192 = vector.broadcast %191 : vector<16x1xf32> to vector<16x16xf32>
      %193 = arith.mulf %172, %192 : vector<16x16xf32>
      %cst_135 = arith.constant dense<0.000000e+00> : vector<16xf32>
      %194 = vector.multi_reduction <add>, %193, %cst_135 [0] : vector<16x16xf32> to vector<16xf32>
      %195 = vector.shape_cast %194 : vector<16xf32> to vector<1x16xf32>
      %cst_136 = arith.constant 1.000000e-30 : f32
      %196 = vector.broadcast %cst_136 : f32 to vector<1x16xf32>
      %197 = arith.maximumf %195, %196 : vector<1x16xf32>
      %198 = tpu.reciprocal %197 {approx = true} : vector<1x16xf32> -> vector<1x16xf32>
      %199 = vector.broadcast %198 : vector<1x16xf32> to vector<16x16xf32>
      %200 = arith.mulf %193, %199 : vector<16x16xf32>
      %201 = arith.truncf %200 : vector<16x16xf32> to vector<16x16xbf16>
      %cst_137 = arith.constant dense<0.000000e+00> : vector<16x32xf32>
      %202 = tpu.matmul %201, %143, %cst_137 {dimension_numbers = #tpu.dot_dimension_numbers<[0], [0], [1], [1], [0, 1, 1, 1], [], []>} : vector<16x16xbf16>, vector<16x32xbf16>, vector<16x32xf32> -> vector<16x32xf32>
      %203 = arith.truncf %202 : vector<16x32xf32> to vector<16x32xbf16>
      %204 = arith.index_cast %137 : i32 to index
      %205 = arith.index_cast %154 : i32 to index
      %c0_138 = arith.constant 0 : index
      %206 = vector.load %arg18[%204, %205, %c0_138] : memref<4x32x32xbf16, #tpu.memory_space<vmem>>, vector<1x16x32xbf16>
      %207 = vector.shape_cast %206 : vector<1x16x32xbf16> to vector<16x32xbf16>
      %208 = vector.shape_cast %203 : vector<16x32xbf16> to vector<1x16x32xbf16>
      tpu.vector_store %arg18[%204, %205, %c0_138], %208 {strides = array<i32>} : memref<4x32x32xbf16, #tpu.memory_space<vmem>>, vector<1x16x32xbf16>,
      %c1_i32_139 = arith.constant 1 : i32
      %c0_140 = arith.constant 0 : index
      %c0_141 = arith.constant 0 : index
      %209 = vector.load %arg22[%c0_140, %c0_141] : memref<16x32xf32, #tpu.memory_space<vmem>>, vector<16x32xf32>
      %c0_142 = arith.constant 0 : index
      %c0_143 = arith.constant 0 : index
      %210 = vector.load %arg21[%c0_142, %c0_143] : memref<16x1xf32, #tpu.memory_space<vmem>>, vector<16x1xf32>
      %211 = tpu.reciprocal %210 {approx = true} : vector<16x1xf32> -> vector<16x1xf32>
      %212 = vector.broadcast %211 : vector<16x1xf32> to vector<16x32xf32>
      %213 = arith.mulf %209, %212 : vector<16x32xf32>
      %214 = arith.truncf %213 : vector<16x32xf32> to vector<16x32xbf16>
      %215 = arith.index_cast %137 : i32 to index
      %c0_144 = arith.constant 0 : index
      %c0_145 = arith.constant 0 : index
      %216 = vector.load %arg18[%215, %c0_144, %c0_145] : memref<4x32x32xbf16, #tpu.memory_space<vmem>>, vector<1x16x32xbf16>
      %217 = vector.shape_cast %216 : vector<1x16x32xbf16> to vector<16x32xbf16>
      %218 = vector.shape_cast %214 : vector<16x32xbf16> to vector<1x16x32xbf16>
      tpu.vector_store %arg18[%215, %c0_144, %c0_145], %218 {strides = array<i32>} : memref<4x32x32xbf16, #tpu.memory_space<vmem>>, vector<1x16x32xbf16>,
    }
    %c4_i32_35 = arith.constant 4 : i32
    %c0_36 = arith.constant 0 : index
    %c0_37 = arith.constant 0 : index
    %c0_38 = arith.constant 0 : index
    %55 = vector.load %arg18[%c0_36, %c0_37, %c0_38] : memref<4x32x32xbf16, #tpu.memory_space<vmem>>, vector<1x32x32xbf16>
    %56 = vector.shape_cast %55 : vector<1x32x32xbf16> to vector<32x32xbf16>
    %c0_39 = arith.constant 0 : index
    %c0_40 = arith.constant 0 : index
    %57 = vector.load %arg19[%c0_39, %c0_40] : memref<32x128xbf16, #tpu.memory_space<vmem>>, vector<32x32xbf16>
    tpu.vector_store %arg19[%c0_39, %c0_40], %56 {strides = array<i32>} : memref<32x128xbf16, #tpu.memory_space<vmem>>, vector<32x32xbf16>,
    %c1_41 = arith.constant 1 : index
    %c0_42 = arith.constant 0 : index
    %c0_43 = arith.constant 0 : index
    %58 = vector.load %arg18[%c1_41, %c0_42, %c0_43] : memref<4x32x32xbf16, #tpu.memory_space<vmem>>, vector<1x32x32xbf16>
    %59 = vector.shape_cast %58 : vector<1x32x32xbf16> to vector<32x32xbf16>
    %c0_44 = arith.constant 0 : index
    %c32 = arith.constant 32 : index
    %60 = vector.load %arg19[%c0_44, %c32] : memref<32x128xbf16, #tpu.memory_space<vmem>>, vector<32x32xbf16>
    tpu.vector_store %arg19[%c0_44, %c32], %59 {strides = array<i32>} : memref<32x128xbf16, #tpu.memory_space<vmem>>, vector<32x32xbf16>,
    %c2_45 = arith.constant 2 : index
    %c0_46 = arith.constant 0 : index
    %c0_47 = arith.constant 0 : index
    %61 = vector.load %arg18[%c2_45, %c0_46, %c0_47] : memref<4x32x32xbf16, #tpu.memory_space<vmem>>, vector<1x32x32xbf16>
    %62 = vector.shape_cast %61 : vector<1x32x32xbf16> to vector<32x32xbf16>
    %c0_48 = arith.constant 0 : index
    %c64 = arith.constant 64 : index
    %63 = vector.load %arg19[%c0_48, %c64] : memref<32x128xbf16, #tpu.memory_space<vmem>>, vector<32x32xbf16>
    tpu.vector_store %arg19[%c0_48, %c64], %62 {strides = array<i32>} : memref<32x128xbf16, #tpu.memory_space<vmem>>, vector<32x32xbf16>,
    %c3_49 = arith.constant 3 : index
    %c0_50 = arith.constant 0 : index
    %c0_51 = arith.constant 0 : index
    %64 = vector.load %arg18[%c3_49, %c0_50, %c0_51] : memref<4x32x32xbf16, #tpu.memory_space<vmem>>, vector<1x32x32xbf16>
    %65 = vector.shape_cast %64 : vector<1x32x32xbf16> to vector<32x32xbf16>
    %c0_52 = arith.constant 0 : index
    %c96 = arith.constant 96 : index
    %66 = vector.load %arg19[%c0_52, %c96] : memref<32x128xbf16, #tpu.memory_space<vmem>>, vector<32x32xbf16>
    tpu.vector_store %arg19[%c0_52, %c96], %65 {strides = array<i32>} : memref<32x128xbf16, #tpu.memory_space<vmem>>, vector<32x32xbf16>,
    %c0_53 = arith.constant 0 : index
    %c0_54 = arith.constant 0 : index
    %67 = vector.load %arg19[%c0_53, %c0_54] : memref<32x128xbf16, #tpu.memory_space<vmem>>, vector<32x128xbf16>
    %c0_55 = arith.constant 0 : index
    %c0_56 = arith.constant 0 : index
    %68 = vector.load %arg5[%c0_55, %c0_56] : memref<128x128xbf16, #tpu.memory_space<vmem>>, vector<128x128xbf16>
    %cst_57 = arith.constant dense<0.000000e+00> : vector<32x128xf32>
    %69 = tpu.matmul %67, %68, %cst_57 {dimension_numbers = #tpu.dot_dimension_numbers<[1], [0], [0], [1], [0, 0, 1, 1], [], []>} : vector<32x128xbf16>, vector<128x128xbf16>, vector<32x128xf32> -> vector<32x128xf32>
    %c0_58 = arith.constant 0 : index
    %c0_59 = arith.constant 0 : index
    %70 = vector.load %arg6[%c0_58, %c0_59] : memref<1x128xf32, #tpu.memory_space<vmem>>, vector<1x128xf32>
    %71 = vector.broadcast %70 : vector<1x128xf32> to vector<32x128xf32>
    %72 = arith.addf %69, %71 : vector<32x128xf32>
    %c0_60 = arith.constant 0 : index
    %c0_61 = arith.constant 0 : index
    %73 = vector.load %arg7[%c0_60, %c0_61] : memref<256x256xbf16, #tpu.memory_space<vmem>>, vector<128x256xbf16>
    %cst_62 = arith.constant dense<0.000000e+00> : vector<32x256xf32>
    %74 = tpu.matmul %8, %73, %cst_62 {dimension_numbers = #tpu.dot_dimension_numbers<[1], [0], [0], [1], [0, 0, 1, 1], [], []>} : vector<32x128xbf16>, vector<128x256xbf16>, vector<32x256xf32> -> vector<32x256xf32>
    %75 = arith.truncf %72 : vector<32x128xf32> to vector<32x128xbf16>
    %c128 = arith.constant 128 : index
    %c0_63 = arith.constant 0 : index
    %76 = vector.load %arg7[%c128, %c0_63] : memref<256x256xbf16, #tpu.memory_space<vmem>>, vector<128x256xbf16>
    %cst_64 = arith.constant dense<0.000000e+00> : vector<32x256xf32>
    %77 = tpu.matmul %75, %76, %cst_64 {dimension_numbers = #tpu.dot_dimension_numbers<[1], [0], [0], [1], [0, 0, 1, 1], [], []>} : vector<32x128xbf16>, vector<128x256xbf16>, vector<32x256xf32> -> vector<32x256xf32>
    %78 = arith.addf %74, %77 : vector<32x256xf32>
    %c0_65 = arith.constant 0 : index
    %c0_66 = arith.constant 0 : index
    %79 = vector.load %arg8[%c0_65, %c0_66] : memref<1x256xf32, #tpu.memory_space<vmem>>, vector<1x256xf32>
    %80 = vector.broadcast %79 : vector<1x256xf32> to vector<32x256xf32>
    %81 = arith.addf %78, %80 : vector<32x256xf32>
    %cst_67 = arith.constant dense<0.000000e+00> : vector<32xf32>
    %82 = vector.multi_reduction <add>, %81, %cst_67 [1] : vector<32x256xf32> to vector<32xf32>
    %83 = vector.shape_cast %82 : vector<32xf32> to vector<32x1xf32>
    %cst_68 = arith.constant 3.906250e-03 : f32
    %84 = vector.broadcast %cst_68 : f32 to vector<32x1xf32>
    %85 = arith.mulf %83, %84 : vector<32x1xf32>
    %86 = arith.mulf %81, %81 : vector<32x256xf32>
    %cst_69 = arith.constant dense<0.000000e+00> : vector<32xf32>
    %87 = vector.multi_reduction <add>, %86, %cst_69 [1] : vector<32x256xf32> to vector<32xf32>
    %88 = vector.shape_cast %87 : vector<32xf32> to vector<32x1xf32>
    %cst_70 = arith.constant 3.906250e-03 : f32
    %89 = vector.broadcast %cst_70 : f32 to vector<32x1xf32>
    %90 = arith.mulf %88, %89 : vector<32x1xf32>
    %91 = arith.mulf %85, %85 : vector<32x1xf32>
    %92 = arith.subf %90, %91 : vector<32x1xf32>
    %cst_71 = arith.constant 0.000000e+00 : f32
    %93 = vector.broadcast %cst_71 : f32 to vector<32x1xf32>
    %94 = arith.maximumf %92, %93 : vector<32x1xf32>
    %95 = vector.broadcast %85 : vector<32x1xf32> to vector<32x256xf32>
    %96 = arith.subf %81, %95 : vector<32x256xf32>
    %cst_72 = arith.constant 9.99999974E-6 : f32
    %97 = vector.broadcast %cst_72 : f32 to vector<32x1xf32>
    %98 = arith.addf %94, %97 : vector<32x1xf32>
    %99 = math.rsqrt %98 : vector<32x1xf32>
    %100 = vector.broadcast %99 : vector<32x1xf32> to vector<32x256xf32>
    %101 = arith.mulf %96, %100 : vector<32x256xf32>
    %c0_73 = arith.constant 0 : index
    %c0_74 = arith.constant 0 : index
    %102 = vector.load %arg9[%c0_73, %c0_74] : memref<1x256xf32, #tpu.memory_space<vmem>>, vector<1x256xf32>
    %103 = vector.broadcast %102 : vector<1x256xf32> to vector<32x256xf32>
    %104 = arith.mulf %101, %103 : vector<32x256xf32>
    %c0_75 = arith.constant 0 : index
    %c0_76 = arith.constant 0 : index
    %105 = vector.load %arg10[%c0_75, %c0_76] : memref<1x256xf32, #tpu.memory_space<vmem>>, vector<1x256xf32>
    %106 = vector.broadcast %105 : vector<1x256xf32> to vector<32x256xf32>
    %107 = arith.addf %104, %106 : vector<32x256xf32>
    %cst_77 = arith.constant 5.000000e-01 : f32
    %108 = vector.broadcast %cst_77 : f32 to vector<32x256xf32>
    %109 = arith.mulf %108, %107 : vector<32x256xf32>
    %cst_78 = arith.constant 0.707106769 : f32
    %110 = vector.broadcast %cst_78 : f32 to vector<32x256xf32>
    %111 = arith.mulf %107, %110 : vector<32x256xf32>
    %112 = math.erf %111 : vector<32x256xf32>
    %cst_79 = arith.constant 1.000000e+00 : f32
    %113 = vector.broadcast %cst_79 : f32 to vector<32x256xf32>
    %114 = arith.addf %113, %112 : vector<32x256xf32>
    %115 = arith.mulf %109, %114 : vector<32x256xf32>
    %116 = arith.truncf %115 : vector<32x256xf32> to vector<32x256xbf16>
    %c0_80 = arith.constant 0 : index
    %c0_81 = arith.constant 0 : index
    %117 = vector.load %arg11[%c0_80, %c0_81] : memref<256x128xbf16, #tpu.memory_space<vmem>>, vector<256x128xbf16>
    %cst_82 = arith.constant dense<0.000000e+00> : vector<32x128xf32>
    %118 = tpu.matmul %116, %117, %cst_82 {dimension_numbers = #tpu.dot_dimension_numbers<[1], [0], [0], [1], [0, 0, 1, 1], [], []>} : vector<32x256xbf16>, vector<256x128xbf16>, vector<32x128xf32> -> vector<32x128xf32>
    %c0_83 = arith.constant 0 : index
    %c0_84 = arith.constant 0 : index
    %119 = vector.load %arg12[%c0_83, %c0_84] : memref<1x128xf32, #tpu.memory_space<vmem>>, vector<1x128xf32>
    %120 = vector.broadcast %119 : vector<1x128xf32> to vector<32x128xf32>
    %121 = arith.addf %118, %120 : vector<32x128xf32>
    %c0_85 = arith.constant 0 : index
    %c0_86 = arith.constant 0 : index
    %c0_87 = arith.constant 0 : index
    %122 = vector.load %arg1[%c0_85, %c0_86, %c0_87] : memref<1x16x128xf32, #tpu.memory_space<vmem>>, vector<1x16x128xf32>
    %123 = vector.shape_cast %122 : vector<1x16x128xf32> to vector<16x128xf32>
    %124 = vector.extract_strided_slice %121 {offsets = [0, 0], sizes = [16, 128], strides = [1, 1]} : vector<32x128xf32> to vector<16x128xf32>
    %125 = arith.addf %123, %124 : vector<16x128xf32>
    %c0_88 = arith.constant 0 : index
    %c0_89 = arith.constant 0 : index
    %c0_90 = arith.constant 0 : index
    %126 = vector.load %arg13[%c0_88, %c0_89, %c0_90] : memref<1x16x128xf32, #tpu.memory_space<vmem>>, vector<1x16x128xf32>
    %127 = vector.shape_cast %126 : vector<1x16x128xf32> to vector<16x128xf32>
    %128 = vector.shape_cast %125 : vector<16x128xf32> to vector<1x16x128xf32>
    tpu.vector_store %arg13[%c0_88, %c0_89, %c0_90], %128 {strides = array<i32>} : memref<1x16x128xf32, #tpu.memory_space<vmem>>, vector<1x16x128xf32>,
    %c0_91 = arith.constant 0 : index
    %c0_92 = arith.constant 0 : index
    %c0_93 = arith.constant 0 : index
    %129 = vector.load %arg2[%c0_91, %c0_92, %c0_93] : memref<1x16x128xf32, #tpu.memory_space<vmem>>, vector<1x16x128xf32>
    %130 = vector.shape_cast %129 : vector<1x16x128xf32> to vector<16x128xf32>
    %131 = vector.extract_strided_slice %121 {offsets = [16, 0], sizes = [16, 128], strides = [1, 1]} : vector<32x128xf32> to vector<16x128xf32>
    %132 = arith.addf %130, %131 : vector<16x128xf32>
    %c0_94 = arith.constant 0 : index
    %c0_95 = arith.constant 0 : index
    %c0_96 = arith.constant 0 : index
    %133 = vector.load %arg14[%c0_94, %c0_95, %c0_96] : memref<1x16x128xf32, #tpu.memory_space<vmem>>, vector<1x16x128xf32>
    %134 = vector.shape_cast %133 : vector<1x16x128xf32> to vector<16x128xf32>
    %135 = vector.shape_cast %132 : vector<16x128xf32> to vector<1x16x128xf32>
    tpu.vector_store %arg14[%c0_94, %c0_95, %c0_96], %135 {strides = array<i32>} : memref<1x16x128xf32, #tpu.memory_space<vmem>>, vector<1x16x128xf32>,
    return
  }
  func.func @transform_0(%arg0: i32) -> (i32, i32, i32) {
    %c0_i32 = arith.constant 0 : i32
    %c0_i32_0 = arith.constant 0 : i32
    %c0_i32_1 = arith.constant 0 : i32
    return %arg0, %c0_i32, %c0_i32_0 : i32, i32, i32
  }
  func.func @transform_1(%arg0: i32) -> (i32, i32, i32) {
    %c0_i32 = arith.constant 0 : i32
    %c0_i32_0 = arith.constant 0 : i32
    %c0_i32_1 = arith.constant 0 : i32
    return %arg0, %c0_i32, %c0_i32_0 : i32, i32, i32
  }
  func.func @transform_2(%arg0: i32) -> (i32, i32) {
    %c0_i32 = arith.constant 0 : i32
    %c0_i32_0 = arith.constant 0 : i32
    %c0_i32_1 = arith.constant 0 : i32
    return %c0_i32, %c0_i32_0 : i32, i32
  }
  func.func @transform_3(%arg0: i32) -> (i32, i32) {
    %c0_i32 = arith.constant 0 : i32
    %c0_i32_0 = arith.constant 0 : i32
    %c0_i32_1 = arith.constant 0 : i32
    return %c0_i32, %c0_i32_0 : i32, i32
  }
  func.func @transform_4(%arg0: i32) -> (i32, i32) {
    %c0_i32 = arith.constant 0 : i32
    %c0_i32_0 = arith.constant 0 : i32
    %c0_i32_1 = arith.constant 0 : i32
    return %c0_i32, %c0_i32_0 : i32, i32
  }
  func.func @transform_5(%arg0: i32) -> (i32, i32) {
    %c0_i32 = arith.constant 0 : i32
    %c0_i32_0 = arith.constant 0 : i32
    %c0_i32_1 = arith.constant 0 : i32
    return %c0_i32, %c0_i32_0 : i32, i32
  }
  func.func @transform_6(%arg0: i32) -> (i32, i32) {
    %c0_i32 = arith.constant 0 : i32
    %c0_i32_0 = arith.constant 0 : i32
    %c0_i32_1 = arith.constant 0 : i32
    return %c0_i32, %c0_i32_0 : i32, i32
  }
  func.func @transform_7(%arg0: i32) -> (i32, i32) {
    %c0_i32 = arith.constant 0 : i32
    %c0_i32_0 = arith.constant 0 : i32
    %c0_i32_1 = arith.constant 0 : i32
    return %c0_i32, %c0_i32_0 : i32, i32
  }
  func.func @transform_8(%arg0: i32) -> (i32, i32) {
    %c0_i32 = arith.constant 0 : i32
    %c0_i32_0 = arith.constant 0 : i32
    %c0_i32_1 = arith.constant 0 : i32
    return %c0_i32, %c0_i32_0 : i32, i32
  }
  func.func @transform_9(%arg0: i32) -> (i32, i32) {
    %c0_i32 = arith.constant 0 : i32
    %c0_i32_0 = arith.constant 0 : i32
    %c0_i32_1 = arith.constant 0 : i32
    return %c0_i32, %c0_i32_0 : i32, i32
  }
  func.func @transform_10(%arg0: i32) -> (i32, i32) {
    %c0_i32 = arith.constant 0 : i32
    %c0_i32_0 = arith.constant 0 : i32
    %c0_i32_1 = arith.constant 0 : i32
    return %c0_i32, %c0_i32_0 : i32, i32
  }
  func.func @transform_11(%arg0: i32) -> (i32, i32) {
    %c0_i32 = arith.constant 0 : i32
    %c0_i32_0 = arith.constant 0 : i32
    %c0_i32_1 = arith.constant 0 : i32
    return %c0_i32, %c0_i32_0 : i32, i32
  }
  func.func @transform_12(%arg0: i32) -> (i32, i32, i32) {
    %c0_i32 = arith.constant 0 : i32
    %c0_i32_0 = arith.constant 0 : i32
    %c0_i32_1 = arith.constant 0 : i32
    return %arg0, %c0_i32, %c0_i32_0 : i32, i32, i32
  }
  func.func @transform_13(%arg0: i32) -> (i32, i32, i32) {
    %c0_i32 = arith.constant 0 : i32
    %c0_i32_0 = arith.constant 0 : i32
    %c0_i32_1 = arith.constant 0 : i32
    return %arg0, %c0_i32, %c0_i32_0 : i32, i32, i32
  }
}

</mosaic_0001>

<bundles_post_ra>
// kernel: tpu_custom_call.1
= control target key start
LH: loop header
LB: loop body
LE: loop exit
PB: predicated region body
PF: predicated region fallthrough
CT: control target
= control target key end

     0   :  { %s3694_s0 = inlined_call_operand.hbm [shape: f32[2,16,128], index: 0, kind: input, shape index: {}]   ;;  %s3695_s1 = inlined_call_operand.hbm [shape: f32[2,16,128], index: 1, kind: input, shape index: {}]   ;;  %s3696_s2 = inlined_call_operand.hbm [shape: bf16[128,256], index: 2, kind: input, shape index: {}]   ;;  %s3697_s3 = inlined_call_operand.vmem [shape: f32[1,256], index: 3, kind: input, shape index: {}]   ;;  %s3698_s4 = inlined_call_operand.hbm [shape: bf16[128,128], index: 4, kind: input, shape index: {}]   ;;  %s3699_s5 = inlined_call_operand.vmem [shape: f32[1,128], index: 5, kind: input, shape index: {}]   ;;  %s3700_s6 = inlined_call_operand.hbm [shape: bf16[256,256], index: 6, kind: input, shape index: {}]   ;;  %s3701_s7 = inlined_call_operand.vmem [shape: f32[1,256], index: 7, kind: input, shape index: {}]   ;;  %s3702_s8 = inlined_call_operand.vmem [shape: f32[1,256], index: 8, kind: input, shape index: {}]   ;;  %s3703_s9 = inlined_call_operand.vmem [shape: f32[1,256], index: 9, kind: input, shape index: {}]   ;;  %s3704_s10 = inlined_call_operand.hbm [shape: bf16[256,128], index: 10, kind: input, shape index: {}]   ;;  %s3705_s11 = inlined_call_operand.vmem [shape: f32[1,128], index: 11, kind: input, shape index: {}]   ;;  %s3706_s12 = inlined_call_operand.hbm [shape: f32[2,16,128], index: 12, kind: output, shape index: {0}]   ;;  %s3707_s13 = inlined_call_operand.hbm [shape: f32[2,16,128], index: 13, kind: output, shape index: {1}]  }
   0x1   :  { %3720 = sst [smem:[#allocation34_spill]] %s3696_s2 }
   0x2   :  { %3721 = sst [smem:[#allocation35_spill]] %s3698_s4 }
   0x3   :  { %3722 = sst [smem:[#allocation36_spill]] %s3700_s6 }
   0x4   :  { %3723 = sst [smem:[#allocation37_spill]] %s3703_s9 }
   0x5   :  { %3724 = sst [smem:[#allocation38_spill]] %s3704_s10 }
   0x6   :  { %3725 = sst [smem:[#allocation39_spill]] %s3705_s11 }
   0x7   :  { %3726 = sst [smem:[#allocation40_spill]] %s3706_s12 }
   0x8   :  { %3727 = sst [smem:[#allocation41_spill]] %s3707_s13 }
   0x9   :  { %19 = vsyncpa [#allocation11], 0 }
   0xa   :  { %21 = vsyncpa [#allocation11 + $0x1], 0 }
   0xb   :  { %22 = vsyncpa [#allocation14], 0 }
   0xc   :  { %24 = vsyncpa [#allocation14 + $0x1], 0 }
   0xd   :  { %25 = vsyncpa [#allocation17], 0 }
   0xe   :  { %26 = vsyncpa [#allocation20], 0 }
   0xf   :  { %27 = vsyncpa [#allocation12], 0 }
  0x10   :  { %29 = vsyncpa [#allocation12 + $0x1], 0 }
  0x11   :  { %30 = vsyncpa [#allocation23], 0 }
  0x12   :  { %32 = vsyncpa [#allocation23 + $0x1], 0  ;;  %s3071_s25 = smov 0   ;;  %s3073_s26 = smov 0  }
  0x13   :  { %s3075_s27 = smov 0   ;;  %s3077_s28 = smov 0  }
  0x14 LB: > { %3728 = sst [smem:[#allocation31_spill]] %s2961_s25  ;;  %s3092_s29 = sadd.s32 4294967295, %s2973_s28   ;;  %s2973_s28 = sphi %s3077_s28, %s3766_s28   ;;  %s2969_s27 = sphi %s3075_s27, %s3765_s27   ;;  %s2965_s26 = sphi %s3073_s26, %s3764_s26   ;;  %s2961_s25 = sphi %s3071_s25, %s3763_s25  }
  0x15   : > { %s2188_s30 = sadd.s32 4294967294, %s2973_s28   ;;  %p58_p0 = scmp.ne.s32.totalorder %s2965_s26, %s2961_s25 }
  0x16   : > { %p3710_p1 = scmp.eq.s32.totalorder %s3092_s29, 0  ;;  %p324_p3 = scmp.eq.s32.totalorder %s2188_s30, 1 }
  0x17   : > { %p2189_p5 = scmp.ge.s32.totalorder %s2973_s28, 1  ;;  %p357_p7 = scmp.lt.s32.totalorder %s2973_s28, 3 }
  0x18   : > { %p3101_p4 = por %p3710_p1, %p58_p0  ;;  %p3106_p6 = por %p324_p3, %p58_p0 }
  0x19   : > { %p3111_p8 = pnand %p2189_p5, %p357_p7  ;;  %s2979_s17 = smov [#allocation15]  }
  0x1a   : > { %s3729_s14 = scalar_select %p3101_p4, 1, 0 }
  0x1b   : > { %s3730_s15 = scalar_select %p3106_p6, 1, 0 }
  0x1c   : > { %s3732_s16 = scalar_select %p3111_p8, 1, 0 }
  0x1d   : > { %3731 = sst [smem:[#allocation32_spill]] %s3730_s15  ;;  %s369_s18 = sshll.u32 %s2979_s17, 4  ;;  %s3115_s18 = int_to_ptr.vmem [resolvable:$true] %s369_s18 }
  0x1e   : > { %p2448_p9 = pneg %p3111_p8  ;;  %s2980_s20 = smov [#allocation16]  }
  0x1f   : > { %s385_s21 = sshll.u32 %s2980_s20, 4  ;;  %s3734_s2 = sld [smem:[#allocation34_spill]]  ;;  %s3126_s21 = int_to_ptr.vmem [resolvable:$true] %s385_s21 }
  0x20   : > { %p3122_p11 = pnand %p2448_p9, %p3710_p1 }
  0x22   : > { %p3136_p13 = pneg %p3122_p11 }
  0x25   : > { %s2683_s24 = scalar_lea.hbm %s3734_s2, 2048 }
  0x26   : > { %p2684_p12 = scmp.ne.s32.totalorder %s3734_s2, %s2683_s24  ;;  %p2690_p5 = scmp.lt.u32.totalorder %s2683_s24, %s3734_s2 }
  0x28   : > { %p2686_p0 = pnand %p3136_p13, %p2684_p12 }
  0x2a   : > { %p2687_p3 = pneg %p2686_p0 }
  0x2c   : > { %p2692_p7 = pnand %p2690_p5, %p2687_p3 }
  0x2e   : > { %2695 = shalt.err (!%p2692_p7)
}
  0x2f   : > { %s2696_s22 = scalar_lea.vmem %s3115_s18, 2048  ;;  %p2704_p2 = scmp.lt.s32.totalorder %s3115_s18, %s3115_s18 }
  0x30   : > { %p2697_p9 = scmp.ne.s32.totalorder %s3115_s18, %s2696_s22  ;;  %p2705_p6 = scmp.lt.s32.totalorder %s2696_s22, %s2696_s22 }
  0x32   : > { %p2699_p10 = pnand %p2697_p9, %p3136_p13  ;;  %p2706_p12 = por %p2705_p6, %p2704_p2 }
  0x34   : > { %p2700_p1 = pneg %p2699_p10 }
  0x36   : > { %p2707_p0 = pnand %p2706_p12, %p2700_p1 }
  0x38   : > { %2710 = shalt.err (!%p2707_p0)
}
  0x39   : > { %s3713_s23 = smov 128   ;;  %s3715_s25 = smov 8  }
  0x3a   : > { %2451 = dma.hbm_to_vmem [thread:$0]  (!%p3122_p11), %s3734_s2, 2048, %s3115_s18, [#allocation14], %s3713_s23, %s3713_s23, %s3715_s25  }
  0x3b   : > { %s3736_s4 = sld [smem:[#allocation35_spill]] }
  0x41   : > { %s2711_s22 = scalar_lea.hbm %s3736_s4, 1024 }
  0x42   : > { %p2712_p1 = scmp.ne.s32.totalorder %s3736_s4, %s2711_s22  ;;  %p2718_p10 = scmp.lt.u32.totalorder %s2711_s22, %s3736_s4 }
  0x44   : > { %p2714_p2 = pnand %p2712_p1, %p3136_p13 }
  0x46   : > { %p2715_p6 = pneg %p2714_p2 }
  0x48   : > { %p2720_p3 = pnand %p2718_p10, %p2715_p6 }
  0x4a   : > { %2723 = shalt.err (!%p2720_p3)
}
  0x4b   : > { %s2724_s18 = scalar_lea.vmem %s3126_s21, 1024  ;;  %p2732_p12 = scmp.lt.s32.totalorder %s3126_s21, %s3126_s21 }
  0x4c   : > { %p2725_p5 = scmp.ne.s32.totalorder %s3126_s21, %s2724_s18  ;;  %p2733_p0 = scmp.lt.s32.totalorder %s2724_s18, %s2724_s18 }
  0x4e   : > { %p2727_p7 = pnand %p2725_p5, %p3136_p13  ;;  %p2734_p1 = por %p2733_p0, %p2732_p12 }
  0x50   : > { %p2728_p9 = pneg %p2727_p7 }
  0x52   : > { %p2735_p2 = pnand %p2734_p1, %p2728_p9 }
  0x54   : > { %2738 = shalt.err (!%p2735_p2)
}
  0x55   : > { %s3719_s12 = smov 64   ;;  %s2984_s9 = smov 4  }
  0x56   : > { %2454 = dma.hbm_to_vmem [thread:$0]  (!%p3122_p11), %s3736_s4, 1024, %s3126_s21, [#allocation17], %s3719_s12, %s3719_s12, %s2984_s9  }
  0x57   : > { %s2985_s24 = smov [#allocation18]   ;;  %s2986_s17 = smov [#allocation19]  }
  0x58   : > { %s401_s30 = sshll.u32 %s2985_s24, 4  ;;  %s423_s20 = sshll.u32 %s2986_s17, 4  ;;  %s402_s30 = int_to_ptr.vmem [resolvable:$true] %s401_s30  ;;  %s3186_s20 = int_to_ptr.vmem [resolvable:$true] %s423_s20 }
  0x59   : > { %s3737_s6 = sld [smem:[#allocation36_spill]] }
  0x5f   : > { %s2739_s23 = scalar_lea.hbm %s3737_s6, 4096 }
  0x60   : > { %p2740_p6 = scmp.ne.s32.totalorder %s3737_s6, %s2739_s23  ;;  %p2746_p5 = scmp.lt.u32.totalorder %s2739_s23, %s3737_s6 }
  0x62   : > { %p2742_p10 = pnand %p2740_p6, %p3136_p13 }
  0x64   : > { %p2743_p3 = pneg %p2742_p10 }
  0x66   : > { %p2748_p7 = pnand %p2746_p5, %p2743_p3 }
  0x68   : > { %2751 = shalt.err (!%p2748_p7)
}
  0x69   : > { %s2752_s13 = scalar_lea.vmem %s402_s30, 4096  ;;  %p2760_p1 = scmp.lt.s32.totalorder %s402_s30, %s402_s30 }
  0x6a   : > { %p2753_p9 = scmp.ne.s32.totalorder %s402_s30, %s2752_s13  ;;  %p2761_p2 = scmp.lt.s32.totalorder %s2752_s13, %s2752_s13 }
  0x6c   : > { %p2755_p12 = pnand %p2753_p9, %p3136_p13  ;;  %p2762_p4 = por %p2761_p2, %p2760_p1 }
  0x6e   : > { %p2756_p0 = pneg %p2755_p12 }
  0x70   : > { %p2763_p8 = pnand %p2762_p4, %p2756_p0 }
  0x72   : > { %2766 = shalt.err (!%p2763_p8)
}
  0x73   : > { %s3738_s2 = smov 8   ;;  %s3739_s25 = smov 128  }
  0x74   : > { %2457 = dma.hbm_to_vmem [thread:$0]  (!%p3122_p11), %s3737_s6, 4096, %s402_s30, [#allocation17], %s3739_s25, %s3739_s25, %s3738_s2  }
  0x75   : > { %s3740_s10 = sld [smem:[#allocation38_spill]] }
  0x7b   : > { %s2767_s18 = scalar_lea.hbm %s3740_s10, 2048 }
  0x7c   : > { %p2768_p6 = scmp.ne.s32.totalorder %s3740_s10, %s2767_s18  ;;  %p2774_p10 = scmp.lt.u32.totalorder %s2767_s18, %s3740_s10 }
  0x7e   : > { %p2770_p4 = pnand %p2768_p6, %p3136_p13 }
  0x80   : > { %p2771_p8 = pneg %p2770_p4 }
  0x82   : > { %p2776_p3 = pnand %p2774_p10, %p2771_p8 }
  0x84   : > { %2779 = shalt.err (!%p2776_p3)
}
  0x85   : > { %s2780_s30 = scalar_lea.vmem %s3186_s20, 2048  ;;  %p2788_p12 = scmp.lt.s32.totalorder %s3186_s20, %s3186_s20 }
  0x86   : > { %p2781_p5 = scmp.ne.s32.totalorder %s3186_s20, %s2780_s30  ;;  %p2789_p0 = scmp.lt.s32.totalorder %s2780_s30, %s2780_s30 }
  0x88   : > { %p2783_p7 = pnand %p2781_p5, %p3136_p13  ;;  %p2790_p1 = por %p2789_p0, %p2788_p12 }
  0x8a   : > { %p2784_p9 = pneg %p2783_p7 }
  0x8c   : > { %p2791_p2 = pnand %p2790_p1, %p2784_p9 }
  0x8e   : > { %2794 = shalt.err (!%p2791_p2)
}
  0x8f   : > { %s3741_s12 = smov 64   ;;  %s3236_s15 = sadd.s32 1, %s2973_s28  }
  0x90   : > { %2460 = dma.hbm_to_vmem [thread:$0]  (!%p3122_p11), %s3740_s10, 2048, %s3186_s20, [#allocation20], %s3741_s12, %s3741_s12, %s2984_s9  }
  0x91   : > { %s42_s19 = ssub.s32 %s2973_s28, %s3236_s15  ;;  %s45_s17 = sadd.s32 1, %s2969_s27 }
  0x92   : > { %p43_p13 = scmp.eq.s32.totalorder %s42_s19, 0  ;;  %p52_p6 = scmp.ne.s32.totalorder %s2969_s27, %s2965_s26 }
  0x93   : > { %p53_p4 = scmp.eq.s32.totalorder %s2973_s28, 0  ;;  %p3743_p10 = scmp.eq.s32.totalorder %s3092_s29, 1 }
  0x94   : > { %s3245_s22 = scalar_select %p43_p13, %s2969_s27, %s45_s17  }
  0x95   : > { %p54_p8 = por %p53_p4, %p52_p6  ;;  %p3249_p3 = por %p3743_p10, %p52_p6 }
  0x96   : > { %3742 = sst [smem:[#allocation33_spill]] %s3245_s22  ;;  %p2479_p5 = scmp.lt.s32.totalorder %s2973_s28, 2 }
  0x97   : > { %s440_s11 = sand.u32 1, %s2969_s27   ;;  %s2308_s9 = sshll.u32 %s2973_s28, 8 }
  0x98   : > { %s2195_s21 = sshll.u32 %s440_s11, 4  ;;  %s3259_s30 = scalar_lea.hbm %s3694_s0, %s2308_s9 }
  0x99   : > { %s444_s12 = scalar_lea.vmem [#allocation10], %s2195_s21  ;;  %p3263_p11 = pnand %p2479_p5, %p54_p8 }
  0x9a   : > { %s451_s24 = sshll.u32 %s444_s12, 4  ;;  %s3270_s20 = scalar_lea.hbm %s3695_s1, %s2308_s9  ;;  %s3261_s24 = int_to_ptr.vmem [resolvable:$true] %s451_s24 }
  0x9b   : > { %s465_s13 = scalar_lea.vmem [#allocation13], %s2195_s21  ;;  %s3274_s6 = scalar_lea.sflag [#allocation11], %s440_s11 }
  0x9c   : > { %s3272_s4 = sshll.u32 %s465_s13, 4  ;;  %s2795_s12 = scalar_lea.hbm %s3259_s30, 256  ;;  %s3306_s4 = int_to_ptr.vmem [resolvable:$true] %s3272_s4 }
  0x9d   : > { %p2796_p7 = scmp.ne.s32.totalorder %s3259_s30, %s2795_s12  ;;  %p2797_p9 = pneg %p3263_p11 }
  0x9e   : > { %s2800_s19 = scalar_lea.hbm %s3694_s0, 512  ;;  %p2801_p1 = scmp.lt.u32.totalorder %s3259_s30, %s3694_s0 }
  0x9f   : > { %p2798_p12 = pnand %p2797_p9, %p2796_p7  ;;  %p2802_p2 = scmp.lt.u32.totalorder %s2800_s19, %s2795_s12 }
  0xa0   : > { %p2804_p6 = scmp.lt.u32.totalorder %s2795_s12, %s3259_s30 }
  0xa1   : > { %p2799_p0 = pneg %p2798_p12  ;;  %p2803_p13 = por %p2802_p2, %p2801_p1 }
  0xa3   : > { %p2805_p4 = por %p2804_p6, %p2803_p13 }
  0xa5   : > { %p2806_p8 = pnand %p2805_p4, %p2799_p0 }
  0xa7   : > { %2809 = shalt.err (!%p2806_p8)
}
  0xa8   : > { %s2810_s11 = scalar_lea.vmem %s3261_s24, 256  ;;  %s2987_s10 = smov [#allocation10]  }
  0xa9   : > { %p2811_p10 = scmp.ne.s32.totalorder %s3261_s24, %s2810_s11  ;;  %s2815_s22 = sshll.u32 %s2987_s10, 4  ;;  %s2816_s22 = int_to_ptr.vmem [resolvable:$false] %s2815_s22 }
  0xaa   : > { %s2817_s21 = scalar_lea.vmem %s2816_s22, 512  ;;  %p2818_p12 = scmp.lt.s32.totalorder %s3261_s24, %s2816_s22 }
  0xab   : > { %p2813_p5 = pnand %p2811_p10, %p2797_p9  ;;  %p2819_p1 = scmp.lt.s32.totalorder %s2817_s21, %s2810_s11 }
  0xad   : > { %p2814_p7 = pneg %p2813_p5  ;;  %p2820_p2 = por %p2819_p1, %p2818_p12 }
  0xaf   : > { %p2821_p13 = pnand %p2820_p2, %p2814_p7 }
  0xb1   : > { %2824 = shalt.err (!%p2821_p13)
}
  0xb2   : > { %2464 = dma.hbm_to_vmem [thread:$0]  (!%p3263_p11), %s3259_s30, 256, %s3261_s24, %s3274_s6, %s3739_s25, %s3739_s25, %s3738_s2  }
  0xb3   : > { %s461_s13 = sand.u32 1, %s2973_s28   ;;  %s2825_s19 = scalar_lea.hbm %s3270_s20, 256 }
  0xb4   : > { %s3309_s12 = scalar_lea.sflag [#allocation14], %s461_s13  ;;  %p2826_p0 = scmp.ne.s32.totalorder %s3270_s20, %s2825_s19 }
  0xb5   : > { %s2830_s11 = scalar_lea.hbm %s3695_s1, 512  ;;  %p2831_p8 = scmp.lt.u32.totalorder %s3270_s20, %s3695_s1 }
  0xb6   : > { %p2828_p6 = pnand %p2826_p0, %p2797_p9  ;;  %p2832_p10 = scmp.lt.u32.totalorder %s2830_s11, %s2825_s19 }
  0xb7   : > { %p2834_p7 = scmp.lt.u32.totalorder %s2825_s19, %s3270_s20 }
  0xb8   : > { %p2829_p4 = pneg %p2828_p6  ;;  %p2833_p5 = por %p2832_p10, %p2831_p8 }
  0xba   : > { %p2835_p12 = por %p2834_p7, %p2833_p5 }
  0xbc   : > { %p2836_p1 = pnand %p2835_p12, %p2829_p4 }
  0xbe   : > { %2839 = shalt.err (!%p2836_p1)
}
  0xbf   : > { %s2840_s6 = scalar_lea.vmem %s3306_s4, 256  ;;  %s2988_s30 = smov [#allocation13]  }
  0xc0   : > { %p2841_p2 = scmp.ne.s32.totalorder %s3306_s4, %s2840_s6  ;;  %s2845_s24 = sshll.u32 %s2988_s30, 4  ;;  %s2846_s24 = int_to_ptr.vmem [resolvable:$false] %s2845_s24 }
  0xc1   : > { %s2847_s21 = scalar_lea.vmem %s2846_s24, 512  ;;  %p2848_p6 = scmp.lt.s32.totalorder %s3306_s4, %s2846_s24 }
  0xc2   : > { %p2843_p13 = pnand %p2841_p2, %p2797_p9  ;;  %p2849_p8 = scmp.lt.s32.totalorder %s2847_s21, %s2840_s6 }
  0xc4   : > { %p2844_p0 = pneg %p2843_p13  ;;  %p2850_p10 = por %p2849_p8, %p2848_p6 }
  0xc6   : > { %p2851_p5 = pnand %p2850_p10, %p2844_p0 }
  0xc8   : > { %2854 = shalt.err (!%p2851_p5)
}
  0xc9   : > { %2467 = dma.hbm_to_vmem [thread:$0]  (!%p3263_p11), %s3270_s20, 256, %s3306_s4, %s3309_s12, %s3739_s25, %s3739_s25, %s3738_s2  }
  0xca   : > { %p3746_p9 = scmp.ne.s32.totalorder %s3732_s16, 0 }
  0xcb   : > { %s3341_s13 = sand.u32 (!%p3746_p9), 1, %s2965_s26   ;;  %p3747_p4 = scmp.ne.s32.totalorder (!%p3746_p9), %s3729_s14, 0 }
  0xcc   : > { %484 = sbr.rel (%p3746_p9) target bundleno = 2561 (0xa01), region = 68  ;;  %s3344_s19 = sshll.u32 (!%p3746_p9), %s3341_s13, 4 }
  0xcd   : > { %s487_s23 = scalar_lea.sflag (!%p3746_p9), [#allocation11], %s3341_s13  ;;  %s3348_s17 = scalar_lea.vmem (!%p3746_p9), [#allocation10], %s3344_s19 }
  0xd3   : > { %2932 = dma.done.wait (%p3747_p4), %s487_s23, 256  }
  0xd4   : > { %2934 = vsyncadd (%p3747_p4), %s487_s23, 4294967040  ;;  %s495_s4 = sand.u32 1, %s3092_s29   ;;  %s3356_s2 = scalar_lea.vmem [#allocation13], %s3344_s19 }
  0xd5   : > { %s496_s16 = scalar_lea.sflag [#allocation14], %s495_s4 }
  0xd6   : > { %2936 = dma.done.wait (%p3747_p4), %s496_s16, 256  }
  0xd7   : > { %2938 = vsyncadd (%p3747_p4), %s496_s16, 4294967040  ;;  %p3748_p11 = scmp.eq.s32.totalorder %s3092_s29, 0 }
  0xd9   : > { %2940 = dma.done.wait (%p3748_p11), [#allocation14], 2048   ;;  %p3749_p7 = pmov %p3748_p11 }
  0xdb   : > { %2942 = vsyncadd (%p3749_p7), [#allocation14], 4294965248  ;;  %p3750_p12 = pmov %p3749_p7 }
  0xdc   : > { %p3751_p1 = pmov %p3749_p7 }
  0xdd   : > { %2944 = dma.done.wait (%p3750_p12), [#allocation17], 5120  }
  0xde   : > { %2946 = vsyncadd (%p3751_p1), [#allocation17], 4294962176  ;;  %p3752_p2 = pmov %p3751_p1 }
  0xdf   : > { %p3753_p13 = pmov %p3751_p1 }
  0xe0   : > { %2948 = dma.done.wait (%p3752_p2), [#allocation20], 2048  }
  0xe1   : > { %2950 = vsyncadd (%p3753_p13), [#allocation20], 4294965248  ;;  %v2989_v0 = vmov 0   ;;  %v2543_v1 = vld [vmem:[#allocation15 + $0x4] ss:$8 sps:$4 sm:$0xff]   ;;  %v597_v23 = vlaneseq  ;;  %vm742_vm0 = vcmask 261120  }
  0xe2   : > { %719 = vmatprep.mubr.bf16.mxu0 %v2989_v0  ;;  %729 = vmatprep.mubr.bf16.mxu1 %v2989_v0  ;;  %v2545_v2 = vld [vmem:[#allocation15] ss:$8 sps:$4 sm:$0xff]   ;;  %v2546_v3 = vld [vmem:[#allocation15 + $0x14] ss:$8 sps:$4 sm:$0xff]   ;;  %v2548_v4 = vld [vmem:[#allocation15 + $0x10] ss:$8 sps:$4 sm:$0xff]  }
  0xe3   : > { %687 = vmatprep.subr.bf16.mxu0 %v2543_v1  ;;  %2400 = vmatprep.subr.bf16.mxu1 %v2543_v1  ;;  %v2549_v5 = vld [vmem:[#allocation15 + $0x24] ss:$8 sps:$4 sm:$0xff]   ;;  %v2551_v6 = vld [vmem:[#allocation15 + $0x20] ss:$8 sps:$4 sm:$0xff]   ;;  %v2552_v7 = vld [vmem:[#allocation15 + $0x34] ss:$8 sps:$4 sm:$0xff]  }
  0xe4   : > { %688 = vmatpush1.bf16.msra.mxu0 %v2545_v2  ;;  %2408 = vmatpush1.bf16.msra.mxu1 %v2545_v2  ;;  %v2554_v8 = vld [vmem:[#allocation15 + $0x30] ss:$8 sps:$4 sm:$0xff]   ;;  %v2555_v9 = vld [vmem:[#allocation15 + $0x44] ss:$8 sps:$4 sm:$0xff]   ;;  %v2557_v10 = vld [vmem:[#allocation15 + $0x40] ss:$8 sps:$4 sm:$0xff]  }
  0xe5   : > { %689 = vmatprep.subr.bf16.mxu0 %v2546_v3  ;;  %2401 = vmatprep.subr.bf16.mxu1 %v2546_v3  ;;  %v2558_v11 = vld [vmem:[#allocation15 + $0x54] ss:$8 sps:$4 sm:$0xff]   ;;  %v2560_v12 = vld [vmem:[#allocation15 + $0x50] ss:$8 sps:$4 sm:$0xff]   ;;  %v2561_v13 = vld [vmem:[#allocation15 + $0x64] ss:$8 sps:$4 sm:$0xff]  }
  0xe6   : > { %v2563_v14 = vld [vmem:[#allocation15 + $0x60] ss:$8 sps:$4 sm:$0xff]   ;;  %v2564_v15 = vld [vmem:[#allocation15 + $0x74] ss:$8 sps:$4 sm:$0xff]   ;;  %v2566_v16 = vld [vmem:[#allocation15 + $0x70] ss:$8 sps:$4 sm:$0xff]  }
  0xe7   : > { %v569_v17 = vld [vmem:[%s3348_s17] sm:$0xff]  ;;  %v570_v18 = vld [vmem:[%s3348_s17 + $0x8] sm:$0xff]  ;;  %v598_v24 = vshrl.u32 %v597_v23, 7  ;;  %s2990_s20 = smov 64   ;;  %s2991_s12 = smov 96  }
  0xe8   : > { %690 = vmatpush1.bf16.msra.mxu0 %v2548_v4  ;;  %2409 = vmatpush1.bf16.msra.mxu1 %v2548_v4  ;;  %v573_v19 = vld [vmem:[%s3356_s2] sm:$0xff]  ;;  %v574_v20 = vld [vmem:[%s3356_s2 + $0x8] sm:$0xff]  ;;  %v3380_v21 = vpack.c.bf16 %v570_v18, %v569_v17  ;;  %s2992_s9 = smov 32   ;;  %s3424_s11 = scalar_lea.vmem [#allocation21], %s3344_s19 }
  0xe9   : > { %691 = vmatprep.subr.bf16.mxu0 %v2549_v5  ;;  %2402 = vmatprep.subr.bf16.mxu1 %v2549_v5  ;;  %v3382_v22 = vpack.c.bf16 %v574_v20, %v573_v19  ;;  %v3386_v25 = vsub.s32 0, %v598_v24  ;;  %v595_v26 = vld [vmem:[%s3697_s3] sm:$0x3]  ;;  %v3391_v27 = vsub.s32 1, %v598_v24  ;;  %s3427_s10 = scalar_lea.vmem [#allocation22], %s3344_s19  ;;  %s3429_s22 = smov 0  }
  0xeb   : > { %v600_v28 = vrot.slane %v595_v26, %v3386_v25  ;;  %v604_v31 = vrot.slane %v595_v26, %v3391_v27 }
  0xec   : > { %692 = vmatpush1.bf16.msra.mxu0 %v2551_v6  ;;  %2410 = vmatpush1.bf16.msra.mxu1 %v2551_v6 }
  0xed   : > { %693 = vmatprep.subr.bf16.mxu0 %v2552_v7  ;;  %2403 = vmatprep.subr.bf16.mxu1 %v2552_v7 }
  0xf0   : > { %694 = vmatpush1.bf16.msra.mxu0 %v2554_v8  ;;  %2411 = vmatpush1.bf16.msra.mxu1 %v2554_v8 }
  0xf1   : > { %695 = vmatprep.subr.bf16.mxu0 %v2555_v9  ;;  %2404 = vmatprep.subr.bf16.mxu1 %v2555_v9 }
  0xf4   : > { %696 = vmatpush1.bf16.msra.mxu0 %v2557_v10  ;;  %2412 = vmatpush1.bf16.msra.mxu1 %v2557_v10 }
  0xf5   : > { %697 = vmatprep.subr.bf16.mxu0 %v2558_v11  ;;  %2405 = vmatprep.subr.bf16.mxu1 %v2558_v11 }
  0xf8   : > { %698 = vmatpush1.bf16.msra.mxu0 %v2560_v12  ;;  %2413 = vmatpush1.bf16.msra.mxu1 %v2560_v12 }
  0xf9   : > { %699 = vmatprep.subr.bf16.mxu0 %v2561_v13  ;;  %2406 = vmatprep.subr.bf16.mxu1 %v2561_v13 }
  0xfc   : > { %700 = vmatpush1.bf16.msra.mxu0 %v2563_v14  ;;  %2414 = vmatpush1.bf16.msra.mxu1 %v2563_v14 }
  0xfd   : > { %701 = vmatprep.subr.bf16.mxu0 %v2564_v15  ;;  %2407 = vmatprep.subr.bf16.mxu1 %v2564_v15 }
 0x100   : > { %702 = vmatpush1.bf16.msra.mxu0 %v2566_v16  ;;  %2415 = vmatpush1.bf16.msra.mxu1 %v2566_v16 }
 0x103   : > { %720 = vmatmul.mubr.bf16.vlgmr.msra.gmra.mrb[0].mxu0 %v3380_v21  ;;  %730 = vmatmul.mubr.bf16.vlgmr.msra.gmra.mrb[0].mxu1 %v3382_v22 }
 0x1d6   : > { %v721_v29 = vpop.f32.mrb[0].mxu0  ;;  %v731_v30 = vpop.f32.mrb[0].mxu1 }
 0x1d7   : > { %v723_v32 = vpop.f32.mrb[1].mxu0  ;;  %v733_v33 = vpop.f32.mrb[1].mxu1  ;;  %v722_v36 = vadd.f32 %v721_v29, %v600_v28  ;;  %v732_v37 = vadd.f32 %v731_v30, %v600_v28 }
 0x1d8   : > { %v725_v34 = vpop.f32.mrb[2].mxu0  ;;  %v735_v35 = vpop.f32.mrb[2].mxu1  ;;  %v724_v42 = vadd.f32 %v723_v32, %v604_v31  ;;  %v734_v43 = vadd.f32 %v733_v33, %v604_v31 }
 0x1d9   : > { %v726_v38 = vadd.f32 %v725_v34, %v600_v28  ;;  %v736_v39 = vadd.f32 %v735_v35, %v600_v28  ;;  %v727_v40 = vpop.f32.mrb[3].mxu0  ;;  %v737_v41 = vpop.f32.mrb[3].mxu1 }
 0x1da   : > { %v728_v44 = vadd.f32 %v727_v40, %v604_v31  ;;  %v738_v45 = vadd.f32 %v737_v41, %v604_v31 }
 0x1db   : > { %v740_v46 = vpack.c.bf16 %v726_v38, %v722_v36  ;;  %v741_v47 = vpack.c.bf16 %v736_v39, %v732_v37 }
 0x1dc   : > { %v745_v48 = vpack.c.bf16 %v728_v44, %v724_v42  ;;  %v746_v49 = vpack.c.bf16 %v738_v45, %v734_v43 }
 0x1dd   : > { %743 = vst.msk [vmem:[#allocation3] sm:$0xff] %vm742_vm0, %v740_v46  ;;  %744 = vst.msk [vmem:[#allocation3 + $0x8] sm:$0xff] %vm742_vm0, %v741_v47  ;;  %773 = vrot.lane.b32.xlu1 %v741_v47, %s2990_s20  ;;  %751 = vrot.lane.b32.xlu0 %v740_v46, %s2991_s12 }
 0x1de   : > { %747 = vst.msk [vmem:[#allocation4] sm:$0xff] %vm742_vm0, %v745_v48  ;;  %748 = vst.msk [vmem:[#allocation4 + $0x8] sm:$0xff] %vm742_vm0, %v746_v49 }
 0x1e1   : > { %791 = vrot.lane.b32.xlu1 %v741_v47, %s2992_s9  ;;  %753 = vrot.lane.b32.xlu0 %v741_v47, %s2991_s12 }
 0x1e5   : > { %762 = vrot.lane.b32.xlu1 %v745_v48, %s2991_s12  ;;  %771 = vrot.lane.b32.xlu0 %v740_v46, %s2990_s20 }
 0x1e9   : > { %764 = vrot.lane.b32.xlu1 %v746_v49, %s2991_s12  ;;  %789 = vrot.lane.b32.xlu0 %v740_v46, %s2992_s9 }
 0x1ed   : > { %782 = vrot.lane.b32.xlu1 %v746_v49, %s2990_s20  ;;  %780 = vrot.lane.b32.xlu0 %v745_v48, %s2990_s20 }
 0x1f1   : > { %800 = vrot.lane.b32.xlu1 %v746_v49, %s2992_s9  ;;  %798 = vrot.lane.b32.xlu0 %v745_v48, %s2992_s9 }
 0x24f   : > { %v774_v50 = vpop.permute.xlu1 %773  ;;  %v752_v51 = vpop.permute.xlu0 %751 }
 0x250   : > { %779 = vst.msk [vmem:[#allocation3 + $0x28] sm:$0xff] %vm742_vm0, %v774_v50  ;;  %758 = vst.msk [vmem:[#allocation3 + $0x10] sm:$0xff] %vm742_vm0, %v752_v51 }
 0x253   : > { %v792_v52 = vpop.permute.xlu1 %791  ;;  %v754_v53 = vpop.permute.xlu0 %753 }
 0x254   : > { %797 = vst.msk [vmem:[#allocation3 + $0x38] sm:$0xff] %vm742_vm0, %v792_v52  ;;  %759 = vst.msk [vmem:[#allocation3 + $0x18] sm:$0xff] %vm742_vm0, %v754_v53 }
 0x257   : > { %v763_v54 = vpop.permute.xlu1 %762  ;;  %v772_v55 = vpop.permute.xlu0 %771 }
 0x258   : > { %769 = vst.msk [vmem:[#allocation4 + $0x10] sm:$0xff] %vm742_vm0, %v763_v54  ;;  %778 = vst.msk [vmem:[#allocation3 + $0x20] sm:$0xff] %vm742_vm0, %v772_v55 }
 0x25b   : > { %v765_v56 = vpop.permute.xlu1 %764  ;;  %v790_v57 = vpop.permute.xlu0 %789 }
 0x25c   : > { %770 = vst.msk [vmem:[#allocation4 + $0x18] sm:$0xff] %vm742_vm0, %v765_v56  ;;  %796 = vst.msk [vmem:[#allocation3 + $0x30] sm:$0xff] %vm742_vm0, %v790_v57 }
 0x25f   : > { %v783_v58 = vpop.permute.xlu1 %782  ;;  %v781_v59 = vpop.permute.xlu0 %780 }
 0x260   : > { %788 = vst.msk [vmem:[#allocation4 + $0x28] sm:$0xff] %vm742_vm0, %v783_v58  ;;  %787 = vst.msk [vmem:[#allocation4 + $0x20] sm:$0xff] %vm742_vm0, %v781_v59 }
 0x263   : > { %v801_v60 = vpop.permute.xlu1 %800  ;;  %v799_v61 = vpop.permute.xlu0 %798 }
 0x264   : > { %806 = vst.msk [vmem:[#allocation4 + $0x38] sm:$0xff] %vm742_vm0, %v801_v60  ;;  %805 = vst.msk [vmem:[#allocation4 + $0x30] sm:$0xff] %vm742_vm0, %v799_v61 }
 0x265 LB: >> { %v2993_v62 = vmov 0.0   ;;  %vm2994_vm1 = vmmov 0   ;;  %s3442_s6 = sshll.u32 %s2977_s22, 4  ;;  %vm820_vm2 = vcmask 7168   ;;  %v2995_v3 = vmov -1e+30   ;;  %s2977_s22 = sphi %s3429_s22, %s812_s22  }
 0x266   : >> { %2362 = vmatprep.subr.bf16.mxu0 %v2993_v62  ;;  %825 = vst.msk [vmem:[#allocation9] sm:$0xff] %vm742_vm0, %v2993_v62  ;;  %826 = vst.msk [vmem:[#allocation9 + $0x8] sm:$0xff] %vm742_vm0, %v2993_v62  ;;  %2364 = vmatprep.mubr.msk.bf16.mxu0 %vm2994_vm1, %v2993_v62  ;;  %s815_s30 = scalar_lea.vmem [#allocation3], %s3442_s6  ;;  %vm883_vm3 = vcmask 130048   ;;  %v2996_v10 = vmov 0   ;;  %s818_s24 = scalar_lea.vmem [#allocation4], %s3442_s6 }
 0x267   : >> { %2368 = vmatprep.subr.bf16.mxu1 %v2993_v62  ;;  %2370 = vmatprep.mubr.msk.bf16.mxu1 %vm2994_vm1, %v2993_v62  ;;  %v2231_v63 = vld [vmem:[%s815_s30 + $0x8] sm:$0xff]  ;;  %v816_v2 = vld [vmem:[%s815_s30] sm:$0xff]  ;;  %821 = vst.msk [vmem:[#allocation7] sm:$0xff] %vm820_vm2, %v2995_v3  ;;  %822 = vst.msk [vmem:[#allocation7 + $0x8] sm:$0xff] %vm820_vm2, %v2995_v3  ;;  %s2085_s21 = scalar_lea.vmem [#allocation5], %s3442_s6  ;;  %s812_s22 = sadd.s32 1, %s2977_s22  }
 0x268   : >> { %v838_v1 = vsel %vm742_vm0, %v2231_v63, 0  ;;  %823 = vst.msk [vmem:[#allocation8] sm:$0xff] %vm820_vm2, %v2993_v62  ;;  %824 = vst.msk [vmem:[#allocation8 + $0x8] sm:$0xff] %vm820_vm2, %v2993_v62  ;;  %2567 = vset.pattern.permute.xlu1 %v2996_v10  ;;  %2568 = vset.pattern.permute.xlu0 %v2996_v10  ;;  %p809_p0 = scmp.ge.s32.totalorder %s812_s22, 4  }
 0x269   : >> { %2363 = vmatpush3.bf16.xpose.msra.mxu0 %v838_v1  ;;  %vm1135_vm4 = vcmask (%p809_p0), 523520   ;;  %vm1149_vm5 = vcmask (%p809_p0), 785920   ;;  %vm1163_vm6 = vcmask (%p809_p0), 1048320   ;;  %s3755_s30 = sld [smem:[#allocation39_spill]] (%p809_p0)  ;;  %s3756_s4 = sld [smem:[#allocation40_spill]] (%p809_p0) }
 0x26a   : > { %s2997_s25 = smov (%p809_p0), [#allocation21]  }
 0x26b   : >> { %v2234_v28 = vld [vmem:[%s818_s24 + $0x8] sm:$0xff]  ;;  %v819_v47 = vld [vmem:[%s818_s24] sm:$0xff]  ;;  %s2316_s24 = sshll.u32 (%p809_p0), %s3092_s29, 8 }
 0x26c   : >> { %2369 = vmatpush3.bf16.msra.mxu1 %v2234_v28 }
 0x26d   : >> { %2374 = vmatprep.subr.bf16.mxu1 %v2993_v62 }
 0x26e   : >> { %v3458_v11 = vld [vmem:[#allocation7] sm:$0xff]  ;;  %v3463_v14 = vld [vmem:[#allocation7 + $0x8] sm:$0xff] }
 0x26f   : >> { %v915_v10 = vld [vmem:[#allocation8 + $0x8] sm:$0xff]  ;;  %s3602_s16 = scalar_lea.hbm (%p809_p0), %s3756_s4, %s2316_s24 }
 0x270   : >> { %2365 = vmatmul.mubr.msk.bf16.vlgmr.msra.gmra.mrb[0].mxu0 %vm742_vm0, %v816_v2 }
 0x343   : >> { %v874_v4 = vpop.f32.mrb[0].mxu0 }
 0x344   : >> { %v2366_v5 = vpop.f32.mrb[1].mxu0  ;;  %v884_v6 = vsel %vm883_vm3, %v874_v4, -inf }
 0x345   : >> { %885 = vmax.xlane.f32.xlu0 %v884_v6  ;;  %v877_v7 = vpop.f32.mrb[2].mxu0 }
 0x346   : >> { %v2367_v8 = vpop.f32.mrb[3].mxu0  ;;  %v887_v9 = vsel %vm883_vm3, %v877_v7, -inf }
 0x349   : >> { %888 = vmax.xlane.f32.xlu0 %v887_v9 }
 0x3d2   : >> { %v886_v12 = vpop.xlane.xlu0 %885 }
 0x3d3   : >> { %v3461_v13 = vmax.f32 %v3458_v11, %v886_v12 }
 0x3d5   : >> { %v892_v15 = vsub.f32 %v3458_v11, %v3461_v13  ;;  %991 = vst.msk [vmem:[#allocation7] sm:$0xff] %vm820_vm2, %v3461_v13  ;;  %900 = vperm.xlu1 %2567, %v3461_v13   ;;  %v993_v18 = vsel %vm820_vm2, %v3461_v13, -inf }
 0x3d6   : >> { %v889_v16 = vpop.xlane.xlu0 %888 }
 0x3d7   : >> { %v3471_v17 = vmax.f32 %v3463_v14, %v889_v16  ;;  %v894_v6 = vmul.f32 1.442695, %v892_v15 }
 0x3d9   : >> { %v893_v19 = vsub.f32 %v3463_v14, %v3471_v17  ;;  %992 = vst.msk [vmem:[#allocation7 + $0x8] sm:$0xff] %vm820_vm2, %v3471_v17  ;;  %v994_v20 = vsel %vm820_vm2, %v3471_v17, -inf  ;;  %905 = vperm.xlu1 %2567, %v3471_v17  }
 0x3da   : >> { %v995_v23 = vmax.f32 %v993_v18, %v994_v20 }
 0x3dc   : >> { %v996_v24 = vrot.slane %v995_v23, 4 }
 0x3de   : >> { %v997_v26 = vmax.f32 %v995_v23, %v996_v24  ;;  %v928_v24 = vld [vmem:[#allocation9] sm:$0xff] }
 0x3e0   : >> { %v998_v29 = vrot.slane %v997_v26, 2 }
 0x3e2   : >> { %v999_v30 = vmax.f32 %v997_v26, %v998_v29  ;;  %v929_v26 = vld [vmem:[#allocation9 + $0x8] sm:$0xff] }
 0x3e4   : >> { %v1000_v31 = vrot.slane %v999_v30, 1 }
 0x3e6   : >> { %v1001_v32 = vmax.f32 %v999_v30, %v1000_v31 }
 0x3e8   : >> { %v1002_v33 = vsub.f32 %v3461_v13, %v1001_v32  ;;  %v1003_v34 = vsub.f32 %v3471_v17, %v1001_v32  ;;  %v914_v13 = vld [vmem:[#allocation8] sm:$0xff] }
 0x3ea   : >> { %v1004_v35 = vmul.f32 1.442695, %v1002_v33  ;;  %v1006_v36 = vmul.f32 1.442695, %v1003_v34 }
 0x3ec   : >> { %2569 = vpow2.f32 %v1004_v35 }
 0x3ed   : >> { %2571 = vpow2.f32 %v1006_v36 }
 0x3f6   : >> { %v2570_v37 = vpop.eup %2569 }
 0x3f7   : >> { %v2572_v38 = vpop.eup %2571  ;;  %1010 = vperm.xlu0 %2568, %v2570_v37  }
 0x3f8   : >> { %1015 = vperm.xlu1 %2567, %v2572_v38  }
 0x454   : >> { %v901_v39 = vpop.permute.xlu1 %900 }
 0x455   : >> { %v908_v40 = vsub.f32 %v874_v4, %v901_v39 }
 0x457   : >> { %v910_v41 = vmul.f32 1.442695, %v908_v40 }
 0x458   : >> { %v906_v42 = vpop.permute.xlu1 %905 }
 0x459   : >> { %v909_v43 = vsub.f32 %v877_v7, %v906_v42  ;;  %2573 = vpow2.f32 %v910_v41  ;;  %v896_v7 = vmul.f32 1.442695, %v893_v19 }
 0x45b   : >> { %v912_v44 = vmul.f32 1.442695, %v909_v43 }
 0x45d   : >> { %2575 = vpow2.f32 %v912_v44 }
 0x463   : >> { %v2574_v45 = vpop.eup %2573 }
 0x464   : >> { %v918_v5 = vsel %vm883_vm3, %v2574_v45, 0.0 }
 0x467   : >> { %v2576_v46 = vpop.eup %2575 }
 0x468   : >> { %v921_v48 = vsel %vm883_vm3, %v2576_v46, 0.0  ;;  %v942_v49 = vpack.c.bf16 %v2576_v46, %v2574_v45 }
 0x469   : >> { %922 = vadd.xlane.f32.xlu0 %v921_v48 }
 0x46a   : >> { %2371 = vmatmul.mubr.msk.bf16.vlgmr.msra.gmra.mrb[0].mxu1 %vm883_vm3, %v942_v49 }
 0x46b   : >> { %2375 = vmatpush3.bf16.msra.mxu1 %v819_v47  ;;  %2376 = vmatprep.mubr.msk.bf16.mxu1 %vm2994_vm1, %v2993_v62 }
 0x476   : >> { %v1011_v50 = vpop.permute.xlu0 %1010 }
 0x477   : >> { %v1016_v51 = vpop.permute.xlu1 %1015  ;;  %v1018_v52 = vmul.f32 %v2574_v45, %v1011_v50 }
 0x478   : >> { %v1019_v53 = vmul.f32 %v2576_v46, %v1016_v51 }
 0x479   : >> { %v1020_v54 = vsel %vm883_vm3, %v1018_v52, 0.0 }
 0x47a   : >> { %v1021_v55 = vsel %vm883_vm3, %v1019_v53, 0.0 }
 0x47b   : >> { %v1022_v56 = vadd.f32 %v1021_v55, %v1020_v54  ;;  %v2587_v55 = vld [vmem:[#allocation16] sm:$0xff] (%p809_p0)  }
 0x47c   : > { %2380 = vmatprep.subr.bf16.mxu0 (%p809_p0), %v2587_v55 }
 0x47d   : >> { %v1023_v57 = vrot.slane %v1022_v56, 4  ;;  %2381 = vmatpush3.bf16.msra.mxu0 (%p809_p0), %v2587_v55  ;;  %v2639_v55 = vld [vmem:[#allocation18 + $0x64] ss:$8 sps:$4 sm:$0xff] (%p809_p0)  }
 0x47f   : >> { %v1024_v58 = vadd.f32 %v1023_v57, %v1022_v56  ;;  %v2588_v56 = vld [vmem:[#allocation16 + $0x8] sm:$0xff] (%p809_p0)  }
 0x480   : > { %2382 = vmatprep.subr.bf16.mxu0 (%p809_p0), %v2588_v56 }
 0x481   : >> { %v1025_v59 = vrot.slane %v1024_v58, 2  ;;  %2383 = vmatpush3.bf16.msra.mxu0 (%p809_p0), %v2588_v56  ;;  %v2637_v56 = vld [vmem:[#allocation18 + $0x60] ss:$8 sps:$4 sm:$0xff] (%p809_p0)  }
 0x483   : >> { %v1026_v60 = vadd.f32 %v1025_v59, %v1024_v58 }
 0x485   : >> { %v1027_v61 = vrot.slane %v1026_v60, 1 }
 0x487   : >> { %v1028_v63 = vadd.f32 %v1027_v61, %v1026_v60  ;;  %v2589_v60 = vld [vmem:[#allocation16 + $0x10] sm:$0xff] (%p809_p0)  }
 0x488   : > { %2384 = vmatprep.subr.bf16.mxu0 (%p809_p0), %v2589_v60 }
 0x489   : >> { %v1029_v1 = vmax.f32 %v1028_v63, 1e-30  ;;  %v2590_v63 = vld [vmem:[#allocation16 + $0x18] sm:$0xff] (%p809_p0)   ;;  %2385 = vmatpush3.bf16.msra.mxu0 (%p809_p0), %v2589_v60 }
 0x48a   : > { %2386 = vmatprep.subr.bf16.mxu0 (%p809_p0), %v2590_v63 }
 0x48b   : >> { %2577 = vrcp.f32 %v1029_v1  ;;  %v2595_v1 = vld [vmem:[#allocation18 + $0x84] ss:$8 sps:$4 sm:$0xff] (%p809_p0)  }
 0x48c   : >> { %2579 = vpow2.f32 %v894_v6  ;;  %1402 = vmatprep.subr.bf16.mxu1 (%p809_p0), %v2595_v1  ;;  %v2592_v6 = vld [vmem:[#allocation16 + $0x28] sm:$0xff] (%p809_p0)  }
 0x48d   : >> { %2581 = vpow2.f32 %v896_v7  ;;  %2387 = vmatpush3.bf16.msra.mxu0 (%p809_p0), %v2590_v63  ;;  %v2603_v7 = vld [vmem:[#allocation18 + $0xa0] ss:$8 sps:$4 sm:$0xff] (%p809_p0)  }
 0x495   : >> { %v2578_v2 = vpop.eup %2577 }
 0x496   : >> { %v1031_v3 = vmul.f32 %v2578_v2, %v1018_v52  ;;  %v1032_v62 = vmul.f32 %v2578_v2, %v1019_v53  ;;  %v2580_v8 = vpop.eup %2579  ;;  %v2597_v2 = vld [vmem:[#allocation18 + $0x80] ss:$8 sps:$4 sm:$0xff] (%p809_p0)  }
 0x497   : >> { %v2582_v9 = vpop.eup %2581  ;;  %v916_v14 = vmul.f32 %v2580_v8, %v914_v13 }
 0x498   : >> { %v1033_v4 = vpack.c.bf16 %v1032_v62, %v1031_v3  ;;  %v917_v12 = vmul.f32 %v2582_v9, %v915_v10  ;;  %v2598_v3 = vld [vmem:[#allocation18 + $0x94] ss:$8 sps:$4 sm:$0xff] (%p809_p0)   ;;  %v2600_v62 = vld [vmem:[#allocation18 + $0x90] ss:$8 sps:$4 sm:$0xff] (%p809_p0)  }
 0x499   : > { %v2593_v10 = vld [vmem:[#allocation16 + $0x30] sm:$0xff] (%p809_p0)  }
 0x49a   : >> { %1034 = vxpose.xlu1.c.b16.start.end [1/1] (short) (narrow) %v1033_v4, 16  ;;  %v2591_v4 = vld [vmem:[#allocation16 + $0x20] sm:$0xff] (%p809_p0)  }
 0x49b   : > { %2388 = vmatprep.subr.bf16.mxu0 (%p809_p0), %v2591_v4 }
 0x49c   : > { %2389 = vmatpush3.bf16.msra.mxu0 (%p809_p0), %v2591_v4 }
 0x49d   : > { %2390 = vmatprep.subr.bf16.mxu0 (%p809_p0), %v2592_v6 }
 0x4a0   : > { %2391 = vmatpush3.bf16.msra.mxu0 (%p809_p0), %v2592_v6 }
 0x4a1   : > { %2392 = vmatprep.subr.bf16.mxu0 (%p809_p0), %v2593_v10 }
 0x4a4   : > { %2393 = vmatpush3.bf16.msra.mxu0 (%p809_p0), %v2593_v10 }
 0x4a7   : >> { %919 = vadd.xlane.f32.xlu1 %v918_v5  ;;  %v2601_v5 = vld [vmem:[#allocation18 + $0xa4] ss:$8 sps:$4 sm:$0xff] (%p809_p0)  }
 0x4b8   : >> { %932 = vperm.xlu1 %2567, %v2580_v8   ;;  %v2604_v8 = vld [vmem:[#allocation18 + $0xb4] ss:$8 sps:$4 sm:$0xff] (%p809_p0)  }
 0x4bc   : >> { %937 = vperm.xlu1 %2567, %v2582_v9   ;;  %v2606_v9 = vld [vmem:[#allocation18 + $0xb0] ss:$8 sps:$4 sm:$0xff] (%p809_p0)  }
 0x4f6   : >> { %v923_v16 = vpop.xlane.xlu0 %922 }
 0x4f7   : >> { %v925_v18 = vadd.f32 %v923_v16, %v917_v12  ;;  %v2607_v12 = vld [vmem:[#allocation18 + $0xc4] ss:$8 sps:$4 sm:$0xff] (%p809_p0)   ;;  %v2609_v16 = vld [vmem:[#allocation18 + $0xc0] ss:$8 sps:$4 sm:$0xff] (%p809_p0)  }
 0x4f9   : >> { %927 = vst.msk [vmem:[#allocation8 + $0x8] sm:$0xff] %vm820_vm2, %v925_v18  ;;  %v2594_v18 = vld [vmem:[#allocation16 + $0x38] sm:$0xff] (%p809_p0)  }
 0x4fa   : > { %2394 = vmatprep.subr.bf16.mxu0 (%p809_p0), %v2594_v18 }
 0x4fb   : > { %2395 = vmatpush3.bf16.msra.mxu0 (%p809_p0), %v2594_v18 }
 0x500   : >> { %v1042_v20 = vpop.trf.xlu1  ;;  %v1101_v23 = vld [vmem:[#allocation8 + $0x8] sm:$0xff] }
 0x501   : >> { %2377 = vmatmul.mubr.msk.bf16.vlgmr.msra.gmra.mrb[4].mxu1 %vm883_vm3, %v1042_v20  ;;  %2583 = vrcp.f32 %v1101_v23  ;;  %v2610_v20 = vld [vmem:[#allocation18 + $0xd4] ss:$8 sps:$4 sm:$0xff] (%p809_p0)   ;;  %v2612_v23 = vld [vmem:[#allocation18 + $0xd0] ss:$8 sps:$4 sm:$0xff] (%p809_p0)  }
 0x502   : > { %1434 = vmatprep.mubr.bf16.mxu1 (%p809_p0), %v2989_v0  ;;  %1403 = vmatpush1.bf16.msra.mxu1 (%p809_p0), %v2597_v2 }
 0x503   : > { %1404 = vmatprep.subr.bf16.mxu1 (%p809_p0), %v2598_v3 }
 0x506   : > { %1405 = vmatpush1.bf16.msra.mxu1 (%p809_p0), %v2600_v62 }
 0x507   : > { %1406 = vmatprep.subr.bf16.mxu1 (%p809_p0), %v2601_v5 }
 0x50a   : > { %1407 = vmatpush1.bf16.msra.mxu1 (%p809_p0), %v2603_v7 }
 0x50b   : >> { %v2584_v11 = vpop.eup %2583  ;;  %1408 = vmatprep.subr.bf16.mxu1 (%p809_p0), %v2604_v8 }
 0x50c   : >> { %1111 = vperm.xlu0 %2568, %v2584_v11   ;;  %v2613_v11 = vld [vmem:[#allocation18 + $0xe4] ss:$8 sps:$4 sm:$0xff] (%p809_p0)  }
 0x50e   : > { %1409 = vmatpush1.bf16.msra.mxu1 (%p809_p0), %v2606_v9 }
 0x50f   : > { %1410 = vmatprep.subr.bf16.mxu1 (%p809_p0), %v2607_v12 }
 0x512   : > { %1411 = vmatpush1.bf16.msra.mxu1 (%p809_p0), %v2609_v16 }
 0x513   : > { %1412 = vmatprep.subr.bf16.mxu1 (%p809_p0), %v2610_v20 }
 0x516   : > { %1413 = vmatpush1.bf16.msra.mxu1 (%p809_p0), %v2612_v23 }
 0x517   : > { %1414 = vmatprep.subr.bf16.mxu1 (%p809_p0), %v2613_v11 }
 0x534   : >> { %v920_v15 = vpop.xlane.xlu1 %919 }
 0x535   : >> { %v924_v17 = vadd.f32 %v920_v15, %v916_v14 }
 0x537   : >> { %926 = vst.msk [vmem:[#allocation8] sm:$0xff] %vm820_vm2, %v924_v17 }
 0x538   : >> { %v933_v19 = vpop.permute.xlu1 %932 }
 0x539   : >> { %v940_v28 = vmul.f32 %v933_v19, %v928_v24 }
 0x53c   : >> { %v938_v29 = vpop.permute.xlu1 %937 }
 0x53d   : >> { %v980_v30 = vpop.f32.mrb[0].mxu1  ;;  %v941_v31 = vmul.f32 %v938_v29, %v929_v26  ;;  %v2615_v29 = vld [vmem:[#allocation18 + $0xe0] ss:$8 sps:$4 sm:$0xff] (%p809_p0)  }
 0x53e   : >> { %v987_v32 = vadd.f32 %v980_v30, %v940_v28  ;;  %v2372_v33 = vpop.f32.mrb[1].mxu1  ;;  %v1100_v34 = vld [vmem:[#allocation8] sm:$0xff]  ;;  %1415 = vmatpush1.bf16.msra.mxu1 (%p809_p0), %v2615_v29  ;;  %v2616_v30 = vld [vmem:[#allocation18 + $0xf4] ss:$8 sps:$4 sm:$0xff] (%p809_p0)  }
 0x53f   : >> { %v983_v35 = vpop.f32.mrb[2].mxu1  ;;  %2585 = vrcp.f32 %v1100_v34  ;;  %1416 = vmatprep.subr.bf16.mxu1 (%p809_p0), %v2616_v30  ;;  %v2242_v34 = vld [vmem:[%s3699_s5] ss:$0 sm:$0xff] (%p809_p0) }
 0x540   : >> { %989 = vst.msk [vmem:[#allocation9] sm:$0xff] %vm742_vm0, %v987_v32  ;;  %v988_v36 = vadd.f32 %v983_v35, %v941_v31  ;;  %v2373_v37 = vpop.f32.mrb[3].mxu1  ;;  %v2618_v31 = vld [vmem:[#allocation18 + $0xf0] ss:$8 sps:$4 sm:$0xff] (%p809_p0)   ;;  %v2621_v32 = vld [vmem:[#allocation18 + $0x4] ss:$8 sps:$4 sm:$0xff] (%p809_p0)  }
 0x542   : >> { %990 = vst.msk [vmem:[#allocation9 + $0x8] sm:$0xff] %vm742_vm0, %v988_v36  ;;  %1417 = vmatpush1.bf16.msra.mxu1 (%p809_p0), %v2618_v31 }
 0x543   : > { %1535 = vmatprep.subr.bf16.mxu1 (%p809_p0), %v2621_v32  ;;  %v2643_v32 = vld [vmem:[#allocation19 + $0x40] sm:$0xff] (%p809_p0)  }
 0x544   : > { %2334 = vmatprep.subr.bf16.mxu0 (%p809_p0), %v2643_v32 }
 0x547   : >> { %v1098_v41 = vld [vmem:[#allocation9] sm:$0xff] }
 0x549   : >> { %v2586_v38 = vpop.eup %2585  ;;  %v1099_v40 = vld [vmem:[#allocation9 + $0x8] sm:$0xff] }
 0x54a   : >> { %1106 = vperm.xlu1 %2567, %v2586_v38  }
 0x58b   : >> { %v1112_v39 = vpop.permute.xlu0 %1111 }
 0x58c   : >> { %v1115_v43 = vmul.f32 %v1112_v39, %v1099_v40 }
 0x5c9   : >> { %v1107_v42 = vpop.permute.xlu1 %1106 }
 0x5ca   : >> { %v1114_v44 = vmul.f32 %v1107_v42, %v1098_v41 }
 0x5cc   : >> { %v1116_v45 = vpack.c.bf16 %v1115_v43, %v1114_v44  ;;  %v2619_v43 = vld [vmem:[#allocation18] ss:$8 sps:$4 sm:$0xff] (%p809_p0)  }
 0x5ce   : >> { %1119 = vst.msk [vmem:[%s2085_s21] sm:$0xff] %vm742_vm0, %v1116_v45  ;;  %v2624_v45 = vld [vmem:[#allocation18 + $0x14] ss:$8 sps:$4 sm:$0xff] (%p809_p0)  }
 0x5d3   : > { %811 = sbr.rel (!%p809_p0) target bundleno = 613 (0x265), region = 181 }
 0x5d4   : >> { %v1087_v46 = vpop.f32.mrb[4].mxu1 }
 0x5d5   : >> { %v2378_v47 = vpop.f32.mrb[5].mxu1 }
 0x5d6   : >> { %v1090_v48 = vpop.f32.mrb[6].mxu1  ;;  %v2627_v47 = vld [vmem:[#allocation18 + $0x24] ss:$8 sps:$4 sm:$0xff] (%p809_p0)  }
 0x5d7   : >> { %v1094_v49 = vpack.c.bf16 %v1090_v48, %v1087_v46  ;;  %v2379_v50 = vpop.f32.mrb[7].mxu1  ;;  %v2622_v46 = vld [vmem:[#allocation18 + $0x10] ss:$8 sps:$4 sm:$0xff] (%p809_p0)   ;;  %v2625_v48 = vld [vmem:[#allocation18 + $0x20] ss:$8 sps:$4 sm:$0xff] (%p809_p0)  }
 0x5d8   : > { %v2628_v50 = vld [vmem:[#allocation18 + $0x30] ss:$8 sps:$4 sm:$0xff] (%p809_p0)  }
 0x5d9   : >> { %2240 = vst.msk [vmem:[%s2085_s21 + $0x8] sm:$0xff] %vm742_vm0, %v1094_v49  ;;  %v2630_v49 = vld [vmem:[#allocation18 + $0x34] ss:$8 sps:$4 sm:$0xff] (%p809_p0)   ;;  %s1983_s21 = sshll.u32 (%p809_p0), %s3424_s11, 4  ;;  %s3604_s21 = int_to_ptr.vmem [resolvable:$true] %s1983_s21 }
 0x5da   : > { %s2855_s14 = scalar_lea.vmem %s3604_s21, 256 }
 0x5db   : > { %p2856_p6 = scmp.ne.s32.totalorder %s3604_s21, %s2855_s14 }
 0x5dd   : > { %p2857_p8 = pnand %p2856_p6, %p3249_p3 }
 0x5df   : > { %p2858_p10 = pneg %p2857_p8 }
 0x5e0   : > { %v1125_v51 = vld [vmem:[#allocation5 + $0x10] sm:$0xff]  ;;  %v1139_v52 = vld [vmem:[#allocation5 + $0x20] sm:$0xff]  ;;  %v1126_v53 = vld [vmem:[#allocation5 + $0x18] sm:$0xff] }
 0x5e1   : > { %1129 = vrot.lane.b32.xlu0 %v1125_v51, %s2992_s9  ;;  %1143 = vrot.lane.b32.xlu1 %v1139_v52, %s2990_s20  ;;  %v1140_v54 = vld [vmem:[#allocation5 + $0x28] sm:$0xff]  ;;  %v1153_v57 = vld [vmem:[#allocation5 + $0x30] sm:$0xff]  ;;  %v1154_v58 = vld [vmem:[#allocation5 + $0x38] sm:$0xff] }
 0x5e2   : > { %v1120_v59 = vld [vmem:[#allocation5] sm:$0xff]  ;;  %v1121_v61 = vld [vmem:[#allocation5 + $0x8] sm:$0xff] }
 0x5e3   : > { %1122 = vst.msk [vmem:[#allocation6] sm:$0xff] %vm742_vm0, %v1120_v59  ;;  %1123 = vst.msk [vmem:[#allocation6 + $0x8] sm:$0xff] %vm742_vm0, %v1121_v61  ;;  %v2633_v51 = vld [vmem:[#allocation18 + $0x44] ss:$8 sps:$4 sm:$0xff]   ;;  %v2631_v52 = vld [vmem:[#allocation18 + $0x40] ss:$8 sps:$4 sm:$0xff]  }
 0x5e4   : > { %v1588_v59 = vld [vmem:[%s3701_s7] sm:$0x3] }
 0x5e5   : > { %1131 = vrot.lane.b32.xlu0 %v1126_v53, %s2992_s9  ;;  %1145 = vrot.lane.b32.xlu1 %v1140_v54, %s2990_s20  ;;  %v2636_v53 = vld [vmem:[#allocation18 + $0x54] ss:$8 sps:$4 sm:$0xff]   ;;  %v2634_v54 = vld [vmem:[#allocation18 + $0x50] ss:$8 sps:$4 sm:$0xff]   ;;  %v1593_v60 = vrot.slane %v1588_v59, %v3386_v25  ;;  %v1597_v61 = vrot.slane %v1588_v59, %v3391_v27  ;;  %s3754_s9 = sld [smem:[#allocation37_spill]]  ;;  %s2859_s20 = sshll.u32 %s2997_s25, 4  ;;  %s2860_s20 = int_to_ptr.vmem [resolvable:$false] %s2859_s20 }
 0x5e6   : > { %p2862_p5 = scmp.lt.s32.totalorder %s3604_s21, %s2860_s20 }
 0x5e9   : > { %1157 = vrot.lane.b32.xlu0 %v1153_v57, %s2991_s12  ;;  %1159 = vrot.lane.b32.xlu1 %v1154_v58, %s2991_s12  ;;  %v2642_v57 = vld [vmem:[#allocation18 + $0x74] ss:$8 sps:$4 sm:$0xff]   ;;  %v2640_v58 = vld [vmem:[#allocation18 + $0x70] ss:$8 sps:$4 sm:$0xff]   ;;  %s2861_s12 = scalar_lea.vmem %s2860_s20, 512 }
 0x5ea   : > { %p2863_p9 = scmp.lt.s32.totalorder %s2861_s12, %s2855_s14 }
 0x5ec   : > { %p2864_p4 = por %p2863_p9, %p2862_p5 }
 0x5ee   : > { %p2865_p11 = pnand %p2864_p4, %p2858_p10 }
 0x653   : > { %v1130_v13 = vpop.permute.xlu0 %1129  ;;  %v1144_v14 = vpop.permute.xlu1 %1143 }
 0x654   : > { %1136 = vst.msk [vmem:[#allocation6] sm:$0xff] %vm1135_vm4, %v1130_v13 }
 0x655   : > { %1150 = vst.msk [vmem:[#allocation6] sm:$0xff] %vm1149_vm5, %v1144_v14 }
 0x657   : > { %v1132_v15 = vpop.permute.xlu0 %1131  ;;  %v1146_v17 = vpop.permute.xlu1 %1145 }
 0x658   : > { %1137 = vst.msk [vmem:[#allocation6 + $0x8] sm:$0xff] %vm1135_vm4, %v1132_v15 }
 0x659   : > { %1151 = vst.msk [vmem:[#allocation6 + $0x8] sm:$0xff] %vm1149_vm5, %v1146_v17 }
 0x65b   : > { %v1158_v19 = vpop.permute.xlu0 %1157  ;;  %v1160_v24 = vpop.permute.xlu1 %1159 }
 0x65c   : > { %1164 = vst.msk [vmem:[#allocation6] sm:$0xff] %vm1163_vm6, %v1158_v19  ;;  %1165 = vst.msk [vmem:[#allocation6 + $0x8] sm:$0xff] %vm1163_vm6, %v1160_v24 }
 0x663   : > { %v1166_v26 = vld [vmem:[#allocation6] sm:$0xff]  ;;  %v1167_v28 = vld [vmem:[#allocation6 + $0x8] sm:$0xff] }
 0x664   : > { %2396 = vmatprep.mubr.bf16.mxu0 %v1166_v26 }
 0x665   : > { %2397 = vmatmul.mubr.bf16.vlgmr.msra.gmra.mrb[0].mxu0 %v1167_v28 }
 0x738   : > { %v2398_v33 = vpop.f32.mrb[0].mxu0 }
 0x739   : > { %v1273_v35 = vpop.f32.mrb[1].mxu0  ;;  %v1282_v37 = vadd.f32 %v2398_v33, %v2242_v34  ;;  %v2644_v33 = vld [vmem:[#allocation19] sm:$0xff]  }
 0x73a   : > { %v2399_v36 = vpop.f32.mrb[2].mxu0  ;;  %v1274_v40 = vadd.f32 %v2242_v34, %v1273_v35  ;;  %2335 = vmatpush3.bf16.msra.mxu0 %v2644_v33  ;;  %v2646_v35 = vld [vmem:[#allocation19 + $0x8] sm:$0xff]  }
 0x73b   : > { %v1285_v38 = vadd.f32 %v2399_v36, %v2242_v34  ;;  %v1276_v39 = vpop.f32.mrb[3].mxu0  ;;  %v2647_v36 = vld [vmem:[#allocation19 + $0x50] sm:$0xff]  }
 0x73c   : > { %v1277_v41 = vadd.f32 %v2242_v34, %v1276_v39  ;;  %v2645_v34 = vld [vmem:[#allocation19 + $0x48] sm:$0xff]   ;;  %v2650_v39 = vld [vmem:[#allocation19 + $0x18] sm:$0xff]  }
 0x73d   : > { %v1305_v42 = vpack.c.bf16 %v1285_v38, %v1282_v37  ;;  %2336 = vmatprep.subr.bf16.mxu0 %v2645_v34  ;;  %v2648_v37 = vld [vmem:[#allocation19 + $0x10] sm:$0xff]   ;;  %v2649_v38 = vld [vmem:[#allocation19 + $0x58] sm:$0xff]  }
 0x73e   : > { %v1304_v44 = vpack.c.bf16 %v1277_v41, %v1274_v40  ;;  %2337 = vmatpush3.bf16.msra.mxu0 %v2646_v35  ;;  %v2651_v40 = vld [vmem:[#allocation19 + $0x60] sm:$0xff]  }
 0x73f   : > { %2338 = vmatprep.subr.bf16.mxu0 %v2647_v36  ;;  %v2652_v41 = vld [vmem:[#allocation19 + $0x20] sm:$0xff]  }
 0x740   : > { %1435 = vmatmul.mubr.bf16.vlgmr.msra.gmra.mrb[0].mxu1 %v1304_v44  ;;  %v2655_v44 = vld [vmem:[#allocation19 + $0x70] sm:$0xff]  }
 0x741   : > { %1536 = vmatpush1.bf16.msra.mxu1 %v2619_v43  ;;  %1444 = vmatprep.mubr.bf16.mxu1 %v2989_v0  ;;  %v2654_v43 = vld [vmem:[#allocation19 + $0x28] sm:$0xff]  }
 0x742   : > { %1537 = vmatprep.subr.bf16.mxu1 %v2624_v45  ;;  %2339 = vmatpush3.bf16.msra.mxu0 %v2648_v37  ;;  %v2656_v45 = vld [vmem:[#allocation19 + $0x30] sm:$0xff]  }
 0x743   : > { %2340 = vmatprep.subr.bf16.mxu0 %v2649_v38 }
 0x745   : > { %1538 = vmatpush1.bf16.msra.mxu1 %v2622_v46  ;;  %v2657_v46 = vld [vmem:[#allocation19 + $0x78] sm:$0xff]  }
 0x746   : > { %1539 = vmatprep.subr.bf16.mxu1 %v2627_v47  ;;  %2341 = vmatpush3.bf16.msra.mxu0 %v2650_v39  ;;  %v2658_v47 = vld [vmem:[#allocation19 + $0x38] sm:$0xff]  }
 0x747   : > { %2342 = vmatprep.subr.bf16.mxu0 %v2651_v40 }
 0x748   : > { %1445 = vmatmul.mubr.bf16.gmra.mrb[4].mxu1 %v1305_v42  ;;  %v2653_v42 = vld [vmem:[#allocation19 + $0x68] sm:$0xff]  }
 0x749   : > { %1540 = vmatpush1.bf16.msra.mxu1 %v2625_v48  ;;  %1567 = vmatprep.mubr.bf16.mxu1 %v2989_v0 }
 0x74a   : > { %1541 = vmatprep.subr.bf16.mxu1 %v2630_v49  ;;  %2343 = vmatpush3.bf16.msra.mxu0 %v2652_v41 }
 0x74b   : > { %2344 = vmatprep.subr.bf16.mxu0 %v2653_v42 }
 0x74d   : > { %1542 = vmatpush1.bf16.msra.mxu1 %v2628_v50 }
 0x74e   : > { %1543 = vmatprep.subr.bf16.mxu1 %v2633_v51  ;;  %2345 = vmatpush3.bf16.msra.mxu0 %v2654_v43 }
 0x74f   : > { %2346 = vmatprep.subr.bf16.mxu0 %v2655_v44 }
 0x751   : > { %1544 = vmatpush1.bf16.msra.mxu1 %v2631_v52 }
 0x752   : > { %1545 = vmatprep.subr.bf16.mxu1 %v2636_v53  ;;  %2347 = vmatpush3.bf16.msra.mxu0 %v2656_v45 }
 0x753   : > { %2348 = vmatprep.subr.bf16.mxu0 %v2657_v46 }
 0x755   : > { %1546 = vmatpush1.bf16.msra.mxu1 %v2634_v54 }
 0x756   : > { %1547 = vmatprep.subr.bf16.mxu1 %v2639_v55  ;;  %2349 = vmatpush3.bf16.msra.mxu0 %v2658_v47 }
 0x759   : > { %1548 = vmatpush1.bf16.msra.mxu1 %v2637_v56 }
 0x75a   : > { %1549 = vmatprep.subr.bf16.mxu1 %v2642_v57 }
 0x75d   : > { %1550 = vmatpush1.bf16.msra.mxu1 %v2640_v58 }
 0x760   : > { %1568 = vmatmul.mubr.bf16.vlgmr.msra.gmra.mrb[0].mxu1 %v3380_v21 }
 0x761   : > { %1577 = vmatprep.mubr.bf16.mxu1 %v2989_v0 }
 0x768   : > { %1578 = vmatmul.mubr.bf16.gmra.mrb[4].mxu1 %v3382_v22 }
 0x833   : > { %v1569_v63 = vpop.f32.mrb[0].mxu1 }
 0x834   : > { %v3532_v1 = vadd.f32 %v1593_v60, %v1569_v63  ;;  %v1571_v2 = vpop.f32.mrb[1].mxu1 }
 0x835   : > { %v3534_v3 = vadd.f32 %v1597_v61, %v1571_v2  ;;  %v1573_v62 = vpop.f32.mrb[2].mxu1 }
 0x836   : > { %v3536_v21 = vadd.f32 %v1593_v60, %v1573_v62  ;;  %v1575_v0 = vpop.f32.mrb[3].mxu1  ;;  %v1624_v5 = vmul.f32 %v3532_v1, %v3532_v1 }
 0x837   : > { %v3538_v4 = vadd.f32 %v1597_v61, %v1575_v0  ;;  %v1608_v22 = vadd.f32 %v3534_v3, %v3532_v1  ;;  %v1625_v6 = vmul.f32 %v3534_v3, %v3534_v3 }
 0x838   : > { %v1626_v8 = vmul.f32 %v3536_v21, %v3536_v21 }
 0x839   : > { %1609 = vadd.xlane.f32.xlu0 %v1608_v22  ;;  %v1611_v7 = vadd.f32 %v3538_v4, %v3536_v21  ;;  %v1627_v9 = vmul.f32 %v3538_v4, %v3538_v4  ;;  %v1632_v12 = vadd.f32 %v1625_v6, %v1624_v5 }
 0x83b   : > { %1612 = vadd.xlane.f32.xlu1 %v1611_v7  ;;  %v1579_v10 = vpop.f32.mrb[4].mxu1  ;;  %v1635_v14 = vadd.f32 %v1627_v9, %v1626_v8 }
 0x83c   : > { %v3552_v16 = vadd.f32 %v1593_v60, %v1579_v10  ;;  %v1581_v18 = vpop.f32.mrb[5].mxu1 }
 0x83d   : > { %v3554_v20 = vadd.f32 %v1597_v61, %v1581_v18  ;;  %1633 = vadd.xlane.f32.xlu0 %v1632_v12  ;;  %v1583_v23 = vpop.f32.mrb[6].mxu1 }
 0x83e   : > { %v3556_v11 = vadd.f32 %v1593_v60, %v1583_v23  ;;  %v1585_v13 = vpop.f32.mrb[7].mxu1  ;;  %v1628_v19 = vmul.f32 %v3552_v16, %v3552_v16 }
 0x83f   : > { %v3558_v15 = vadd.f32 %v1597_v61, %v1585_v13  ;;  %v1614_v17 = vadd.f32 %v3554_v20, %v3552_v16  ;;  %v1629_v24 = vmul.f32 %v3554_v20, %v3554_v20 }
 0x840   : > { %v1630_v29 = vmul.f32 %v3556_v11, %v3556_v11 }
 0x841   : > { %1636 = vadd.xlane.f32.xlu0 %v1635_v14  ;;  %1615 = vadd.xlane.f32.xlu1 %v1614_v17  ;;  %v1638_v26 = vadd.f32 %v1629_v24, %v1628_v19  ;;  %v1617_v28 = vadd.f32 %v3558_v15, %v3556_v11  ;;  %v1631_v30 = vmul.f32 %v3558_v15, %v3558_v15  ;;  %v1684_v17 = vld [vmem:[%s3702_s8] sm:$0x3] }
 0x842   : > { %v1704_v24 = vld [vmem:[%s3754_s9] sm:$0x3] }
 0x843   : > { %v1641_v31 = vadd.f32 %v1631_v30, %v1630_v29  ;;  %v1689_v29 = vrot.slane %v1684_v17, %v3386_v25  ;;  %v1693_v30 = vrot.slane %v1684_v17, %v3391_v27  ;;  %v1709_v35 = vrot.slane %v1704_v24, %v3386_v25 }
 0x844   : > { %v1713_v36 = vrot.slane %v1704_v24, %v3391_v27 }
 0x845   : > { %1639 = vadd.xlane.f32.xlu1 %v1638_v26  ;;  %1618 = vadd.xlane.f32.xlu0 %v1617_v28 }
 0x849   : > { %1642 = vadd.xlane.f32.xlu0 %v1641_v31 }
 0x8c6   : > { %v1610_v48 = vpop.xlane.xlu0 %1609 }
 0x8c7   : > { %v1620_v49 = vmul.f32 0.00390625, %v1610_v48 }
 0x8c8   : > { %v1613_v50 = vpop.xlane.xlu1 %1612 }
 0x8c9   : > { %v1621_v52 = vmul.f32 0.00390625, %v1613_v50  ;;  %v1648_v53 = vmul.f32 %v1620_v49, %v1620_v49  ;;  %v1660_v26 = vsub.f32 %v3532_v1, %v1620_v49  ;;  %v1661_v28 = vsub.f32 %v3534_v3, %v1620_v49 }
 0x8ca   : > { %v1634_v51 = vpop.xlane.xlu0 %1633 }
 0x8cb   : > { %v1644_v54 = vmul.f32 0.00390625, %v1634_v51  ;;  %v1649_v60 = vmul.f32 %v1621_v52, %v1621_v52  ;;  %v1662_v37 = vsub.f32 %v3536_v21, %v1621_v52  ;;  %v1663_v38 = vsub.f32 %v3538_v4, %v1621_v52 }
 0x8cd   : > { %v1652_v55 = vsub.f32 %v1644_v54, %v1648_v53 }
 0x8ce   : > { %v1637_v56 = vpop.xlane.xlu0 %1636  ;;  %v1616_v57 = vpop.xlane.xlu1 %1615 }
 0x8cf   : > { %v1656_v58 = vmax.f32 %v1652_v55, 0.0  ;;  %v1645_v59 = vmul.f32 0.00390625, %v1637_v56  ;;  %v1622_v61 = vmul.f32 0.00390625, %v1616_v57 }
 0x8d1   : > { %v1668_v63 = vadd.f32 1e-05, %v1656_v58  ;;  %v1653_v2 = vsub.f32 %v1645_v59, %v1649_v60  ;;  %v1650_v62 = vmul.f32 %v1622_v61, %v1622_v61  ;;  %v1665_v44 = vsub.f32 %v3554_v20, %v1622_v61 }
 0x8d2   : > { %v1640_v0 = vpop.xlane.xlu1 %1639  ;;  %v1619_v22 = vpop.xlane.xlu0 %1618  ;;  %v1664_v27 = vsub.f32 %v3552_v16, %v1622_v61 }
 0x8d3   : > { %2659 = vrsqrt.f32 %v1668_v63  ;;  %v1657_v5 = vmax.f32 %v1653_v2, 0.0  ;;  %v1646_v6 = vmul.f32 0.00390625, %v1640_v0  ;;  %v1623_v7 = vmul.f32 0.00390625, %v1619_v22 }
 0x8d5   : > { %v1669_v8 = vadd.f32 1e-05, %v1657_v5  ;;  %v1654_v9 = vsub.f32 %v1646_v6, %v1650_v62  ;;  %v1651_v18 = vmul.f32 %v1623_v7, %v1623_v7  ;;  %v1666_v51 = vsub.f32 %v3556_v11, %v1623_v7 }
 0x8d6   : > { %v1643_v10 = vpop.xlane.xlu0 %1642  ;;  %v1667_v52 = vsub.f32 %v3558_v15, %v1623_v7 }
 0x8d7   : > { %2661 = vrsqrt.f32 %v1669_v8  ;;  %v1658_v12 = vmax.f32 %v1654_v9, 0.0  ;;  %v1647_v23 = vmul.f32 0.00390625, %v1643_v10 }
 0x8d9   : > { %v1670_v13 = vadd.f32 1e-05, %v1658_v12  ;;  %v1655_v14 = vsub.f32 %v1647_v23, %v1651_v18 }
 0x8db   : > { %2663 = vrsqrt.f32 %v1670_v13  ;;  %v1659_v19 = vmax.f32 %v1655_v14, 0.0 }
 0x8dd   : > { %v2660_v31 = vpop.eup %2659  ;;  %v1671_v32 = vadd.f32 1e-05, %v1659_v19 }
 0x8de   : > { %v1676_v33 = vmul.f32 %v2660_v31, %v1660_v26  ;;  %v1677_v34 = vmul.f32 %v2660_v31, %v1661_v28 }
 0x8df   : > { %2665 = vrsqrt.f32 %v1671_v32 }
 0x8e0   : > { %v1697_v1 = vmul.f32 %v1693_v30, %v1677_v34  ;;  %v1696_v39 = vmul.f32 %v1689_v29, %v1676_v33 }
 0x8e1   : > { %v2662_v3 = vpop.eup %2661 }
 0x8e2   : > { %v1678_v40 = vmul.f32 %v2662_v3, %v1662_v37  ;;  %v1679_v41 = vmul.f32 %v2662_v3, %v1663_v38  ;;  %v1717_v42 = vadd.f32 %v1713_v36, %v1697_v1  ;;  %v1716_v43 = vadd.f32 %v1709_v35, %v1696_v39 }
 0x8e4   : > { %v1699_v45 = vmul.f32 %v1693_v30, %v1679_v41  ;;  %v1733_v46 = vmul.f32 0.70710677, %v1717_v42  ;;  %v1698_v47 = vmul.f32 %v1689_v29, %v1678_v40  ;;  %v1732_v48 = vmul.f32 0.70710677, %v1716_v43 }
 0x8e5   : > { %v2664_v25 = vpop.eup %2663  ;;  %v1725_v10 = vmul.f32 0.5, %v1717_v42  ;;  %v1724_v23 = vmul.f32 0.5, %v1716_v43 }
 0x8e6   : > { %v1719_v49 = vadd.f32 %v1713_v36, %v1699_v45  ;;  %2667 = verf.f32 %v1733_v46  ;;  %v1718_v21 = vadd.f32 %v1709_v35, %v1698_v47  ;;  %v1681_v4 = vmul.f32 %v2664_v25, %v1665_v44  ;;  %v2283_v47 = vld [vmem:[%s3755_s30] ss:$0 sm:$0xff] }
 0x8e7   : > { %2669 = verf.f32 %v1732_v48  ;;  %v1680_v50 = vmul.f32 %v2664_v25, %v1664_v27 }
 0x8e8   : > { %v1735_v53 = vmul.f32 0.70710677, %v1719_v49  ;;  %v1734_v54 = vmul.f32 0.70710677, %v1718_v21  ;;  %v1701_v55 = vmul.f32 %v1693_v30, %v1681_v4  ;;  %v1727_v12 = vmul.f32 0.5, %v1719_v49  ;;  %v1952_v49 = vld [vmem:[%s3348_s17] sm:$0xff] }
 0x8e9   : > { %v2666_v20 = vpop.eup %2665  ;;  %v1700_v56 = vmul.f32 %v1689_v29, %v1680_v50  ;;  %v1726_v13 = vmul.f32 0.5, %v1718_v21 }
 0x8ea   : > { %2671 = verf.f32 %v1735_v53  ;;  %v1683_v57 = vmul.f32 %v2666_v20, %v1667_v52  ;;  %v1682_v58 = vmul.f32 %v2666_v20, %v1666_v51  ;;  %v1721_v16 = vadd.f32 %v1713_v36, %v1701_v55  ;;  %v1953_v51 = vld [vmem:[%s3348_s17 + $0x8] sm:$0xff]  ;;  %s1965_s17 = scalar_lea.sflag [#allocation12], %s3341_s13 }
 0x8eb   : > { %2673 = verf.f32 %v1734_v54  ;;  %v1720_v59 = vadd.f32 %v1709_v35, %v1700_v56 }
 0x8ec   : > { %v1703_v60 = vmul.f32 %v1693_v30, %v1683_v57  ;;  %v1702_v61 = vmul.f32 %v1689_v29, %v1682_v58  ;;  %v1737_v63 = vmul.f32 0.70710677, %v1721_v16  ;;  %v1958_v57 = vld [vmem:[%s3356_s2] sm:$0xff] }
 0x8ed   : > { %v1736_v2 = vmul.f32 0.70710677, %v1720_v59  ;;  %v1728_v1 = vmul.f32 0.5, %v1720_v59 }
 0x8ee   : > { %v1723_v62 = vadd.f32 %v1713_v36, %v1703_v60  ;;  %v1722_v0 = vadd.f32 %v1709_v35, %v1702_v61  ;;  %2675 = verf.f32 %v1737_v63  ;;  %v1729_v36 = vmul.f32 0.5, %v1721_v16 }
 0x8ef   : > { %2677 = verf.f32 %v1736_v2 }
 0x8f0   : > { %v2668_v11 = vpop.eup %2667  ;;  %v1739_v15 = vmul.f32 0.70710677, %v1723_v62  ;;  %v1738_v22 = vmul.f32 0.70710677, %v1722_v0  ;;  %v1731_v37 = vmul.f32 0.5, %v1723_v62  ;;  %v1730_v39 = vmul.f32 0.5, %v1722_v0 }
 0x8f1   : > { %v2670_v5 = vpop.eup %2669  ;;  %v1749_v6 = vadd.f32 1.0, %v2668_v11 }
 0x8f2   : > { %2679 = verf.f32 %v1739_v15  ;;  %v1748_v8 = vadd.f32 1.0, %v2670_v5 }
 0x8f3   : > { %2681 = verf.f32 %v1738_v22  ;;  %v1757_v17 = vmul.f32 %v1749_v6, %v1725_v10 }
 0x8f4   : > { %v2672_v7 = vpop.eup %2671  ;;  %v1756_v24 = vmul.f32 %v1748_v8, %v1724_v23 }
 0x8f5   : > { %v2674_v9 = vpop.eup %2673  ;;  %v1751_v18 = vadd.f32 1.0, %v2672_v7 }
 0x8f6   : > { %v1750_v14 = vadd.f32 1.0, %v2674_v9 }
 0x8f7   : > { %v1759_v19 = vmul.f32 %v1751_v18, %v1727_v12 }
 0x8f8   : > { %v1758_v26 = vmul.f32 %v1750_v14, %v1726_v13  ;;  %v2676_v28 = vpop.eup %2675 }
 0x8f9   : > { %v1765_v29 = vpack.c.bf16 %v1759_v19, %v1757_v17  ;;  %v2678_v31 = vpop.eup %2677  ;;  %v1753_v32 = vadd.f32 1.0, %v2676_v28 }
 0x8fa   : > { %v1764_v30 = vpack.c.bf16 %v1758_v26, %v1756_v24  ;;  %v1752_v34 = vadd.f32 1.0, %v2678_v31 }
 0x8fb   : > { %1935 = vmatprep.mubr.bf16.mxu0 %v1765_v29  ;;  %v1761_v40 = vmul.f32 %v1753_v32, %v1729_v36 }
 0x8fc   : > { %v2680_v33 = vpop.eup %2679  ;;  %1936 = vmatmul.mubr.bf16.vlgmr.msra.gmra.mrb[4].mxu0 %v1764_v30  ;;  %v1760_v42 = vmul.f32 %v1752_v34, %v1728_v1 }
 0x8fd   : > { %v2682_v35 = vpop.eup %2681  ;;  %v1755_v38 = vadd.f32 1.0, %v2680_v33 }
 0x8fe   : > { %v1754_v3 = vadd.f32 1.0, %v2682_v35 }
 0x8ff   : > { %v1763_v41 = vmul.f32 %v1755_v38, %v1731_v37 }
 0x900   : > { %v1762_v43 = vmul.f32 %v1754_v3, %v1730_v39 }
 0x901   : > { %v1767_v44 = vpack.c.bf16 %v1763_v41, %v1761_v40 }
 0x902   : > { %v1766_v45 = vpack.c.bf16 %v1762_v43, %v1760_v42 }
 0x903   : > { %1943 = vmatprep.mubr.bf16.mxu0 %v1767_v44 }
 0x904   : > { %1944 = vmatmul.mubr.bf16.gmra.mrb[8].mxu0 %v1766_v45 }
 0x9cf   : > { %v2350_v46 = vpop.f32.mrb[4].mxu0 }
 0x9d0   : > { %v2351_v25 = vpop.f32.mrb[5].mxu0 }
 0x9d1   : > { %v2352_v27 = vadd.f32 %v2351_v25, %v2350_v46  ;;  %v2353_v48 = vpop.f32.mrb[6].mxu0 }
 0x9d2   : > { %v2354_v21 = vpop.f32.mrb[7].mxu0 }
 0x9d3   : > { %v1938_v4 = vadd.f32 %v2352_v27, %v2283_v47  ;;  %v2355_v50 = vadd.f32 %v2354_v21, %v2353_v48 }
 0x9d5   : > { %v1954_v52 = vadd.f32 %v1952_v49, %v1938_v4  ;;  %v1941_v53 = vadd.f32 %v2355_v50, %v2283_v47 }
 0x9d7   : > { %1956 = vst [vmem:[%s3424_s11] sm:$0xff] %v1954_v52  ;;  %v1955_v54 = vadd.f32 %v1953_v51, %v1941_v53  ;;  %v2356_v20 = vpop.f32.mrb[8].mxu0 }
 0x9d8   : > { %v2357_v55 = vpop.f32.mrb[9].mxu0 }
 0x9d9   : > { %1957 = vst [vmem:[%s3424_s11 + $0x8] sm:$0xff] %v1955_v54  ;;  %v2358_v56 = vadd.f32 %v2357_v55, %v2356_v20  ;;  %v2359_v58 = vpop.f32.mrb[10].mxu0 }
 0x9da   : > { %v2360_v16 = vpop.f32.mrb[11].mxu0 }
 0x9db   : > { %2868 = shalt.err (!%p2865_p11)
}
 0x9dc   : > { %s2869_s11 = scalar_lea.hbm %s3602_s16, 256  ;;  %s2873_s6 = scalar_lea.hbm %s3756_s4, 512 }
 0x9dd   : > { %p2870_p7 = scmp.ne.s32.totalorder %s3602_s16, %s2869_s11  ;;  %p2874_p2 = scmp.lt.u32.totalorder %s3602_s16, %s3756_s4 }
 0x9de   : > { %p2875_p13 = scmp.lt.u32.totalorder %s2873_s6, %s2869_s11  ;;  %p2877_p6 = scmp.lt.u32.totalorder %s2869_s11, %s3602_s16 }
 0x9df   : > { %p2871_p12 = pnand %p2870_p7, %p3249_p3 }
 0x9e0   : > { %p2876_p0 = por %p2875_p13, %p2874_p2 }
 0x9e1   : > { %p2872_p1 = pneg %p2871_p12 }
 0x9e2   : > { %p2878_p8 = por %p2877_p6, %p2876_p0 }
 0x9e4   : > { %p2879_p10 = pnand %p2878_p8, %p2872_p1 }
 0x9e6   : > { %2882 = shalt.err (!%p2879_p10)
}
 0x9e7   : > { %s2998_s23 = smov 128   ;;  %s2999_s14 = smov 8   ;;  %v1946_v59 = vadd.f32 %v2358_v56, %v2283_v47  ;;  %v2361_v60 = vadd.f32 %v2360_v16, %v2359_v58  ;;  %v1959_v61 = vld [vmem:[%s3356_s2 + $0x8] sm:$0xff] }
 0x9e8   : > { %2444 = dma.vmem_to_hbm [thread:$0]  (%p3249_p3), %s3604_s21, 256, %s3602_s16, %s1965_s17, %s2998_s23, %s2998_s23, %s2999_s14  }
 0x9e9   : > { %s1999_s25 = sshll.u32 %s3427_s10, 4  ;;  %v1960_v63 = vadd.f32 %v1958_v57, %v1946_v59  ;;  %v1949_v2 = vadd.f32 %v2361_v60, %v2283_v47  ;;  %s3757_s11 = sld [smem:[#allocation41_spill]]  ;;  %s3646_s25 = int_to_ptr.vmem [resolvable:$true] %s1999_s25 }
 0x9ea   : > { %s1970_s21 = scalar_lea.sflag [#allocation23], %s3341_s13  ;;  %s2883_s16 = scalar_lea.vmem %s3646_s25, 256 }
 0x9eb   : > { %1962 = vst [vmem:[%s3427_s10] sm:$0xff] %v1960_v63  ;;  %v1961_v62 = vadd.f32 %v1959_v61, %v1949_v2  ;;  %p2884_p5 = scmp.ne.s32.totalorder %s3646_s25, %s2883_s16  ;;  %s3000_s2 = smov [#allocation22]  }
 0x9ec   : > { %s2887_s17 = sshll.u32 %s3000_s2, 4  ;;  %s2888_s17 = int_to_ptr.vmem [resolvable:$false] %s2887_s17 }
 0x9ed   : > { %1963 = vst [vmem:[%s3427_s10 + $0x8] sm:$0xff] %v1961_v62  ;;  %p2885_p9 = pnand %p2884_p5, %p3249_p3  ;;  %s2889_s29 = scalar_lea.vmem %s2888_s17, 512 }
 0x9ee   : > { %p2890_p11 = scmp.lt.s32.totalorder %s3646_s25, %s2888_s17  ;;  %p2891_p7 = scmp.lt.s32.totalorder %s2889_s29, %s2883_s16 }
 0x9ef   : > { %s3644_s9 = scalar_lea.hbm %s3757_s11, %s2316_s24  ;;  %p2886_p4 = pneg %p2885_p9 }
 0x9f0   : > { %p2892_p12 = por %p2891_p7, %p2890_p11 }
 0x9f2   : > { %p2893_p1 = pnand %p2892_p12, %p2886_p4 }
 0x9f4   : > { %2896 = shalt.err (!%p2893_p1)
}
 0x9f5   : > { %s2897_s10 = scalar_lea.hbm %s3644_s9, 256  ;;  %s2901_s6 = scalar_lea.hbm %s3757_s11, 512 }
 0x9f6   : > { %p2898_p2 = scmp.ne.s32.totalorder %s3644_s9, %s2897_s10  ;;  %p2902_p6 = scmp.lt.u32.totalorder %s3644_s9, %s3757_s11 }
 0x9f7   : > { %p2903_p8 = scmp.lt.u32.totalorder %s2901_s6, %s2897_s10  ;;  %p2905_p5 = scmp.lt.u32.totalorder %s2897_s10, %s3644_s9 }
 0x9f8   : > { %p2899_p13 = pnand %p2898_p2, %p3249_p3 }
 0x9f9   : > { %p2904_p10 = por %p2903_p8, %p2902_p6 }
 0x9fa   : > { %p2900_p0 = pneg %p2899_p13 }
 0x9fb   : > { %p2906_p9 = por %p2905_p5, %p2904_p10 }
 0x9fd   : > { %p2907_p4 = pnand %p2906_p9, %p2900_p0 }
 0x9ff   : > { %2910 = shalt.err (!%p2907_p4)
}
 0xa00   : > { %2445 = dma.vmem_to_hbm [thread:$0]  (%p3249_p3), %s3646_s25, 256, %s3644_s9, %s1970_s21, %s2998_s23, %s2998_s23, %s2999_s14  }
 0xa01 PF: > { %s3758_s20 = sld [smem:[#allocation31_spill]]  ;;  %s3759_s12 = sld [smem:[#allocation32_spill]] }
 0xa02   : > { %p3761_p7 = scmp.ge.s32.totalorder %s2973_s28, 2 }
 0xa07   : > { %s2014_s16 = sand.u32 1, %s3758_s20   ;;  %p3760_p11 = scmp.ne.s32.totalorder %s3759_s12, 0 }
 0xa08   : > { %s2015_s2 = scalar_lea.sflag [#allocation12], %s2014_s16 }
 0xa09   : > { %p2469_p12 = pnand %p3761_p7, %p3760_p11 }
 0xa0b   : > { %2952 = dma.done.wait (!%p2469_p12), %s2015_s2, 256  }
 0xa0c   : > { %2954 = vsyncadd (!%p2469_p12), %s2015_s2, 4294967040  ;;  %s2024_s18 = scalar_lea.sflag [#allocation23], %s2014_s16 }
 0xa0d   : > { %2956 = dma.done.wait (!%p2469_p12), %s2024_s18, 256  }
 0xa0e   : > { %2958 = vsyncadd (!%p2469_p12), %s2024_s18, 4294967040  ;;  %s3762_s13 = sld [smem:[#allocation33_spill]]  ;;  %p35_p3 = scmp.ge.s32.totalorder %s3236_s15, 4  }
 0xa0f   : > { %s3763_s25 = smov %s2965_s26  ;;  %s3764_s26 = smov %s2969_s27 }
 0xa10   : > { %s3766_s28 = smov %s3236_s15  ;;  %37 = sbr.rel (!%p35_p3) target bundleno = 20 (0x14), region = 192 }
 0xa14   : > { %s3765_s27 = smov %s3762_s13 }
 0xa17   :  { %2029 = vsyncpa [#allocation11], 1 }
 0xa18   :  { %2031 = vsyncpa [#allocation11 + $0x1], 1 }
 0xa19   :  { %2032 = vsyncpa [#allocation14], 1 }
 0xa1a   :  { %2034 = vsyncpa [#allocation14 + $0x1], 1 }
 0xa1b   :  { %2035 = vsyncpa [#allocation17], 1 }
 0xa1c   :  { %2036 = vsyncpa [#allocation20], 1 }
 0xa1d   :  { %2037 = vsyncpa [#allocation12], 1 }
 0xa1e   :  { %2039 = vsyncpa [#allocation12 + $0x1], 1 }
 0xa1f   :  { %2040 = vsyncpa [#allocation23], 1 }
 0xa20   :  { %2042 = vsyncpa [#allocation23 + $0x1], 1 }

</bundles_post_ra>
